<compile_context>
chip_gen: v7x
topology: tpu7x:2x2x1
jax: 0.10.0
libtpu: 0.0.40
codegen_flags: <defaults>
</compile_context>

<pallas_src>
import numpy as np
import jax
import jax.numpy as jnp
from jax import lax
from jax.experimental import pallas as pl
from jax.experimental.pallas import tpu as pltpu


def lstm_encoder_kernel(emb_ref, len_ref, wih_ref, whh_ref, b_ref,
                        wlin_ref, blin_ref,
                        emb_out_ref, logp_out_ref,
                        pre_sc):
    TB, E = emb_ref.shape
    B, H = emb_out_ref.shape
    T = TB // B

    # ---- hoisted input projection for ALL timesteps: one well-shaped matmul
    pre_sc[...] = (jnp.dot(emb_ref[...], wih_ref[...],
                           preferred_element_type=jnp.float32)
                   + b_ref[...])                      # (T*B, 4H)

    lengths = len_ref[...]                            # (B, 1) int32
    whh = whh_ref[...]                                # (H, 4H), resident

    def step(t, carry):
        h, c, out = carry
        base = pl.multiple_of(t * B, B)
        # PyTorch LSTM gate order: i, f, g, o
        gates = pre_sc[pl.ds(base, B), :] + jnp.dot(
            h, whh, preferred_element_type=jnp.float32)   # (B, 4H)
        i_g = jax.nn.sigmoid(gates[:, 0 * H:1 * H])
        f_g = jax.nn.sigmoid(gates[:, 1 * H:2 * H])
        g_g = jnp.tanh(gates[:, 2 * H:3 * H])
        o_g = jax.nn.sigmoid(gates[:, 3 * H:4 * H])
        c_new = f_g * c + i_g * g_g
        h_new = o_g * jnp.tanh(c_new)
        # gather h at the last valid position of each sequence
        out = jnp.where(lengths == (t + 1), h_new, out)
        return h_new, c_new, out

    zeros = jnp.zeros((B, H), jnp.float32)
    _, _, out = lax.fori_loop(0, T, step, (zeros, zeros, zeros), unroll=True)

    emb_out_ref[...] = out

    # linear + LogSoftmax(dim=1) on the lane-dense padded output width
    logits = jnp.dot(out, wlin_ref[...],
                     preferred_element_type=jnp.float32) + blin_ref[...]
    m = jnp.max(logits, axis=1, keepdims=True)
    lse = m + jnp.log(jnp.sum(jnp.exp(logits - m), axis=1, keepdims=True))
    logp_out_ref[...] = logits - lse


def lstm_encoder_forward(inputs, lengths, params):
    """inputs: (T, B) int32; lengths: (B,) int32 (must be in [1, T]).

    Returns (embeddings (B,H), log_probs (B,O)) from a single pallas_call.
    """
    emb = params["embed"][inputs]                     # (T, B, E) XLA gather
    T, B, E = emb.shape
    H = params["w_hh_t"].shape[0]
    O = params["out_dim"]
    O_pad = params["w_lin_t_pad"].shape[1]

    emb2 = emb.reshape(T * B, E)
    lengths2d = lengths.reshape(B, 1).astype(jnp.int32)

    grid_spec = pltpu.PrefetchScalarGridSpec(
        num_scalar_prefetch=0,
        grid=(1,),
        in_specs=[
            pl.BlockSpec((T * B, E), lambda i: (0, 0)),       # flattened emb
            pl.BlockSpec((B, 1), lambda i: (0, 0)),           # lengths
            pl.BlockSpec((E, 4 * H), lambda i: (0, 0)),       # W_ih^T
            pl.BlockSpec((H, 4 * H), lambda i: (0, 0)),       # W_hh^T
            pl.BlockSpec((1, 4 * H), lambda i: (0, 0)),       # b_ih + b_hh
            pl.BlockSpec((H, O_pad), lambda i: (0, 0)),       # W_lin^T padded
            pl.BlockSpec((1, O_pad), lambda i: (0, 0)),       # b_lin padded
        ],
        out_specs=[
            pl.BlockSpec((B, H), lambda i: (0, 0)),           # embeddings
            pl.BlockSpec((B, O_pad), lambda i: (0, 0)),       # log-probs (pad)
        ],
        scratch_shapes=[
            pltpu.VMEM((T * B, 4 * H), jnp.float32),          # pre-gates
        ],
    )
    emb_out, logp_pad = pl.pallas_call(
        lstm_encoder_kernel,
        out_shape=(jax.ShapeDtypeStruct((B, H), jnp.float32),
                   jax.ShapeDtypeStruct((B, O_pad), jnp.float32)),
        grid_spec=grid_spec,
        compiler_params=pltpu.CompilerParams(
            dimension_semantics=("arbitrary",)),
    )(emb2, lengths2d, params["w_ih_t"], params["w_hh_t"], params["b"],
      params["w_lin_t_pad"], params["b_lin_pad"])

    return emb_out, logp_pad[:, :O]


def reference_forward(inputs, lengths, params):
    """Pure-JAX reference of the PyTorch forward (for verification)."""
    emb = params["embed"][inputs]
    T, B, E = emb.shape
    H = params["w_hh_t"].shape[0]

    def step(carry, x):
        h, c = carry
        gates = x @ params["w_ih_t"] + h @ params["w_hh_t"] + params["b"]
        i_g = jax.nn.sigmoid(gates[:, :H])
        f_g = jax.nn.sigmoid(gates[:, H:2 * H])
        g_g = jnp.tanh(gates[:, 2 * H:3 * H])
        o_g = jax.nn.sigmoid(gates[:, 3 * H:])
        c = f_g * c + i_g * g_g
        h = o_g * jnp.tanh(c)
        return (h, c), h

    init = (jnp.zeros((B, H), jnp.float32), jnp.zeros((B, H), jnp.float32))
    _, hs = jax.lax.scan(step, init, emb)
    out = hs[lengths - 1, jnp.arange(B)]
    logits = out @ params["w_lin_t"] + params["b_lin"]
    return out, jax.nn.log_softmax(logits, axis=1)


def make_params(key, vocab_size, embed_dim, hid_dim, out_dim):
    ks = jax.random.split(key, 7)
    scale = 1.0 / np.sqrt(hid_dim)
    embed = jax.random.normal(ks[0], (vocab_size + 1, embed_dim), jnp.float32)
    embed = embed.at[vocab_size].set(0.0)                      # padding_idx row
    w_ih = jax.random.uniform(ks[1], (4 * hid_dim, embed_dim), jnp.float32,
                              -scale, scale)
    w_hh = jax.random.uniform(ks[2], (4 * hid_dim, hid_dim), jnp.float32,
                              -scale, scale)
    b_ih = jax.random.uniform(ks[3], (4 * hid_dim,), jnp.float32, -scale, scale)
    b_hh = jax.random.uniform(ks[4], (4 * hid_dim,), jnp.float32, -scale, scale)
    w_lin = jax.random.uniform(ks[5], (out_dim, hid_dim), jnp.float32,
                               -scale, scale)
    b_lin = jax.random.uniform(ks[6], (out_dim,), jnp.float32, -scale, scale)

    # lane-dense (multiple-of-128) classifier: zero-pad the weight columns,
    # pad the bias with -1e30 so padded logits vanish under log-softmax.
    O_pad = ((out_dim + 127) // 128) * 128
    w_lin_t = w_lin.T                                          # (H, O)
    w_lin_t_pad = jnp.zeros((hid_dim, O_pad), jnp.float32)
    w_lin_t_pad = w_lin_t_pad.at[:, :out_dim].set(w_lin_t)
    b_lin_pad = jnp.full((1, O_pad), -1e30, jnp.float32)
    b_lin_pad = b_lin_pad.at[0, :out_dim].set(b_lin)

    return {
        "embed": embed,
        "w_ih_t": w_ih.T,                        # (E, 4H)
        "w_hh_t": w_hh.T,                        # (H, 4H)
        "b": (b_ih + b_hh).reshape(1, -1),       # (1, 4H)
        "w_lin_t": w_lin_t,                      # (H, O)    (reference only)
        "b_lin": b_lin.reshape(1, -1),           # (1, O)    (reference only)
        "w_lin_t_pad": w_lin_t_pad,              # (H, O_pad)
        "b_lin_pad": b_lin_pad,                  # (1, O_pad)
        "out_dim": out_dim,
    }


if __name__ == "__main__":
    # Small shapes consistent with the module: seq-major tokens, 1-layer LSTM,
    # embedding_size=32, hidden_size=128.
    T, B = 8, 8
    VOCAB, E, H, O = 50, 32, 128, 16

    key = jax.random.PRNGKey(0)
    k_par, k_tok, k_len = jax.random.split(key, 3)
    params = make_params(k_par, VOCAB, E, H, O)

    # lengths in [1, T] (pack_padded_sequence would require this anyway)
    lengths = jax.random.randint(k_len, (B,), 2, T + 1).astype(jnp.int32)
    tokens = jax.random.randint(k_tok, (T, B), 0, VOCAB).astype(jnp.int32)
    # positions >= length are padding (token id == VOCAB, the padding_idx row)
    pos = jnp.arange(T)[:, None]
    tokens = jnp.where(pos < lengths[None, :], tokens, VOCAB)

    emb_out, logp_out = lstm_encoder_forward(tokens, lengths, params)
    jax.block_until_ready((emb_out, logp_out))

    ref_emb, ref_logp = reference_forward(tokens, lengths, params)
    np.testing.assert_allclose(np.asarray(emb_out), np.asarray(ref_emb),
                               rtol=1e-4, atol=1e-4)
    np.testing.assert_allclose(np.asarray(logp_out), np.asarray(ref_logp),
                               rtol=1e-4, atol=1e-4)
    print("KERNEL_OK")
</pallas_src>

<mosaic_0001>
module attributes {stable_mosaic.version = 11 : i64} {
  func.func @lstm_encoder_kernel(%arg0: i32, %arg1: memref<64x32xf32, #tpu.memory_space<vmem>>, %arg2: memref<8x1xi32, #tpu.memory_space<vmem>>, %arg3: memref<32x512xf32, #tpu.memory_space<vmem>>, %arg4: memref<128x512xf32, #tpu.memory_space<vmem>>, %arg5: memref<1x512xf32, #tpu.memory_space<vmem>>, %arg6: memref<128x128xf32, #tpu.memory_space<vmem>>, %arg7: memref<1x128xf32, #tpu.memory_space<vmem>>, %arg8: memref<8x128xf32, #tpu.memory_space<vmem>>, %arg9: memref<8x128xf32, #tpu.memory_space<vmem>>, %arg10: memref<64x512xf32, #tpu.memory_space<vmem>>) attributes {dimension_semantics = [#tpu.dimension_semantics<arbitrary>], iteration_bounds = array<i64: 1>, scalar_prefetch = 0 : i64, scratch_operands = 1 : i64, tpu.core_type = #tpu.core_type<tc>, window_params = [{pipeline_mode = #tpu.pipeline_mode<synchronous>, transform_indices = @transform_0, window_bounds = array<i64: 64, 32>}, {pipeline_mode = #tpu.pipeline_mode<synchronous>, transform_indices = @transform_1, window_bounds = array<i64: 8, 1>}, {pipeline_mode = #tpu.pipeline_mode<synchronous>, transform_indices = @transform_2, window_bounds = array<i64: 32, 512>}, {pipeline_mode = #tpu.pipeline_mode<synchronous>, transform_indices = @transform_3, window_bounds = array<i64: 128, 512>}, {pipeline_mode = #tpu.pipeline_mode<synchronous>, transform_indices = @transform_4, window_bounds = array<i64: 1, 512>}, {pipeline_mode = #tpu.pipeline_mode<synchronous>, transform_indices = @transform_5, window_bounds = array<i64: 128, 128>}, {pipeline_mode = #tpu.pipeline_mode<synchronous>, transform_indices = @transform_6, window_bounds = array<i64: 1, 128>}, {pipeline_mode = #tpu.pipeline_mode<synchronous>, transform_indices = @transform_7, window_bounds = array<i64: 8, 128>}, {pipeline_mode = #tpu.pipeline_mode<synchronous>, transform_indices = @transform_8, window_bounds = array<i64: 8, 128>}]} {
    %c0 = arith.constant 0 : index
    %c0_0 = arith.constant 0 : index
    %0 = vector.load %arg1[%c0, %c0_0] : memref<64x32xf32, #tpu.memory_space<vmem>>, vector<64x32xf32>
    %c0_1 = arith.constant 0 : index
    %c0_2 = arith.constant 0 : index
    %1 = vector.load %arg3[%c0_1, %c0_2] : memref<32x512xf32, #tpu.memory_space<vmem>>, vector<32x512xf32>
    %cst = arith.constant dense<0.000000e+00> : vector<64x512xf32>
    %2 = tpu.matmul %0, %1, %cst {dimension_numbers = #tpu.dot_dimension_numbers<[1], [0], [0], [1], [0, 0, 1, 1], [], []>} : vector<64x32xf32>, vector<32x512xf32>, vector<64x512xf32> -> vector<64x512xf32>
    %c0_3 = arith.constant 0 : index
    %c0_4 = arith.constant 0 : index
    %3 = vector.load %arg5[%c0_3, %c0_4] : memref<1x512xf32, #tpu.memory_space<vmem>>, vector<1x512xf32>
    %4 = vector.broadcast %3 : vector<1x512xf32> to vector<64x512xf32>
    %5 = arith.addf %2, %4 : vector<64x512xf32>
    %c0_5 = arith.constant 0 : index
    %c0_6 = arith.constant 0 : index
    %6 = vector.load %arg10[%c0_5, %c0_6] : memref<64x512xf32, #tpu.memory_space<vmem>>, vector<64x512xf32>
    tpu.vector_store %arg10[%c0_5, %c0_6], %5 {strides = array<i32>} : memref<64x512xf32, #tpu.memory_space<vmem>>, vector<64x512xf32>,
    %c0_7 = arith.constant 0 : index
    %c0_8 = arith.constant 0 : index
    %7 = vector.load %arg2[%c0_7, %c0_8] : memref<8x1xi32, #tpu.memory_space<vmem>>, vector<8x1xi32>
    %c0_9 = arith.constant 0 : index
    %c0_10 = arith.constant 0 : index
    %8 = vector.load %arg4[%c0_9, %c0_10] : memref<128x512xf32, #tpu.memory_space<vmem>>, vector<128x512xf32>
    %cst_11 = arith.constant 0.000000e+00 : f32
    %9 = vector.broadcast %cst_11 : f32 to vector<8x128xf32>
    %c0_i32 = arith.constant 0 : i32
    %c8_i32 = arith.constant 8 : i32
    %10 = arith.muli %c0_i32, %c8_i32 : i32
    %11 = tpu.assume_multiple %10, 8 : i32
    %12 = arith.index_cast %11 : i32 to index
    %c0_12 = arith.constant 0 : index
    %13 = vector.load %arg10[%12, %c0_12] : memref<64x512xf32, #tpu.memory_space<vmem>>, vector<8x512xf32>
    %cst_13 = arith.constant dense<0.000000e+00> : vector<8x512xf32>
    %14 = tpu.matmul %9, %8, %cst_13 {dimension_numbers = #tpu.dot_dimension_numbers<[1], [0], [0], [1], [0, 0, 1, 1], [], []>} : vector<8x128xf32>, vector<128x512xf32>, vector<8x512xf32> -> vector<8x512xf32>
    %15 = arith.addf %13, %14 : vector<8x512xf32>
    %16 = vector.extract_strided_slice %15 {offsets = [0, 0], sizes = [8, 128], strides = [1, 1]} : vector<8x512xf32> to vector<8x128xf32>
    %17 = arith.negf %16 : vector<8x128xf32>
    %18 = math.exp %17 : vector<8x128xf32>
    %cst_14 = arith.constant 1.000000e+00 : f32
    %19 = vector.broadcast %cst_14 : f32 to vector<8x128xf32>
    %20 = arith.addf %19, %18 : vector<8x128xf32>
    %21 = arith.divf %19, %20 : vector<8x128xf32>
    %22 = vector.extract_strided_slice %15 {offsets = [0, 128], sizes = [8, 128], strides = [1, 1]} : vector<8x512xf32> to vector<8x128xf32>
    %23 = arith.negf %22 : vector<8x128xf32>
    %24 = math.exp %23 : vector<8x128xf32>
    %cst_15 = arith.constant 1.000000e+00 : f32
    %25 = vector.broadcast %cst_15 : f32 to vector<8x128xf32>
    %26 = arith.addf %25, %24 : vector<8x128xf32>
    %27 = arith.divf %25, %26 : vector<8x128xf32>
    %28 = vector.extract_strided_slice %15 {offsets = [0, 256], sizes = [8, 128], strides = [1, 1]} : vector<8x512xf32> to vector<8x128xf32>
    %29 = math.tanh %28 : vector<8x128xf32>
    %30 = vector.extract_strided_slice %15 {offsets = [0, 384], sizes = [8, 128], strides = [1, 1]} : vector<8x512xf32> to vector<8x128xf32>
    %31 = arith.negf %30 : vector<8x128xf32>
    %32 = math.exp %31 : vector<8x128xf32>
    %cst_16 = arith.constant 1.000000e+00 : f32
    %33 = vector.broadcast %cst_16 : f32 to vector<8x128xf32>
    %34 = arith.addf %33, %32 : vector<8x128xf32>
    %35 = arith.divf %33, %34 : vector<8x128xf32>
    %36 = arith.mulf %27, %9 : vector<8x128xf32>
    %37 = arith.mulf %21, %29 : vector<8x128xf32>
    %38 = arith.addf %36, %37 : vector<8x128xf32>
    %39 = math.tanh %38 : vector<8x128xf32>
    %40 = arith.mulf %35, %39 : vector<8x128xf32>
    %c1_i32 = arith.constant 1 : i32
    %41 = arith.addi %c0_i32, %c1_i32 : i32
    %42 = vector.broadcast %41 : i32 to vector<8x1xi32>
    %43 = arith.cmpi eq, %7, %42 : vector<8x1xi32>
    %44 = vector.shape_cast %43 : vector<8x1xi1> to vector<8x1xi1>
    %45 = vector.broadcast %44 : vector<8x1xi1> to vector<8x128xi1>
    %46 = arith.select %45, %40, %9 : vector<8x128xi1>, vector<8x128xf32>
    %c1_i32_17 = arith.constant 1 : i32
    %c8_i32_18 = arith.constant 8 : i32
    %47 = arith.muli %c1_i32_17, %c8_i32_18 : i32
    %48 = tpu.assume_multiple %47, 8 : i32
    %49 = arith.index_cast %48 : i32 to index
    %c0_19 = arith.constant 0 : index
    %50 = vector.load %arg10[%49, %c0_19] : memref<64x512xf32, #tpu.memory_space<vmem>>, vector<8x512xf32>
    %cst_20 = arith.constant dense<0.000000e+00> : vector<8x512xf32>
    %51 = tpu.matmul %40, %8, %cst_20 {dimension_numbers = #tpu.dot_dimension_numbers<[1], [0], [0], [1], [0, 0, 1, 1], [], []>} : vector<8x128xf32>, vector<128x512xf32>, vector<8x512xf32> -> vector<8x512xf32>
    %52 = arith.addf %50, %51 : vector<8x512xf32>
    %53 = vector.extract_strided_slice %52 {offsets = [0, 0], sizes = [8, 128], strides = [1, 1]} : vector<8x512xf32> to vector<8x128xf32>
    %54 = arith.negf %53 : vector<8x128xf32>
    %55 = math.exp %54 : vector<8x128xf32>
    %cst_21 = arith.constant 1.000000e+00 : f32
    %56 = vector.broadcast %cst_21 : f32 to vector<8x128xf32>
    %57 = arith.addf %56, %55 : vector<8x128xf32>
    %58 = arith.divf %56, %57 : vector<8x128xf32>
    %59 = vector.extract_strided_slice %52 {offsets = [0, 128], sizes = [8, 128], strides = [1, 1]} : vector<8x512xf32> to vector<8x128xf32>
    %60 = arith.negf %59 : vector<8x128xf32>
    %61 = math.exp %60 : vector<8x128xf32>
    %cst_22 = arith.constant 1.000000e+00 : f32
    %62 = vector.broadcast %cst_22 : f32 to vector<8x128xf32>
    %63 = arith.addf %62, %61 : vector<8x128xf32>
    %64 = arith.divf %62, %63 : vector<8x128xf32>
    %65 = vector.extract_strided_slice %52 {offsets = [0, 256], sizes = [8, 128], strides = [1, 1]} : vector<8x512xf32> to vector<8x128xf32>
    %66 = math.tanh %65 : vector<8x128xf32>
    %67 = vector.extract_strided_slice %52 {offsets = [0, 384], sizes = [8, 128], strides = [1, 1]} : vector<8x512xf32> to vector<8x128xf32>
    %68 = arith.negf %67 : vector<8x128xf32>
    %69 = math.exp %68 : vector<8x128xf32>
    %cst_23 = arith.constant 1.000000e+00 : f32
    %70 = vector.broadcast %cst_23 : f32 to vector<8x128xf32>
    %71 = arith.addf %70, %69 : vector<8x128xf32>
    %72 = arith.divf %70, %71 : vector<8x128xf32>
    %73 = arith.mulf %64, %38 : vector<8x128xf32>
    %74 = arith.mulf %58, %66 : vector<8x128xf32>
    %75 = arith.addf %73, %74 : vector<8x128xf32>
    %76 = math.tanh %75 : vector<8x128xf32>
    %77 = arith.mulf %72, %76 : vector<8x128xf32>
    %c1_i32_24 = arith.constant 1 : i32
    %78 = arith.addi %c1_i32_17, %c1_i32_24 : i32
    %79 = vector.broadcast %78 : i32 to vector<8x1xi32>
    %80 = arith.cmpi eq, %7, %79 : vector<8x1xi32>
    %81 = vector.shape_cast %80 : vector<8x1xi1> to vector<8x1xi1>
    %82 = vector.broadcast %81 : vector<8x1xi1> to vector<8x128xi1>
    %83 = arith.select %82, %77, %46 : vector<8x128xi1>, vector<8x128xf32>
    %c2_i32 = arith.constant 2 : i32
    %c8_i32_25 = arith.constant 8 : i32
    %84 = arith.muli %c2_i32, %c8_i32_25 : i32
    %85 = tpu.assume_multiple %84, 8 : i32
    %86 = arith.index_cast %85 : i32 to index
    %c0_26 = arith.constant 0 : index
    %87 = vector.load %arg10[%86, %c0_26] : memref<64x512xf32, #tpu.memory_space<vmem>>, vector<8x512xf32>
    %cst_27 = arith.constant dense<0.000000e+00> : vector<8x512xf32>
    %88 = tpu.matmul %77, %8, %cst_27 {dimension_numbers = #tpu.dot_dimension_numbers<[1], [0], [0], [1], [0, 0, 1, 1], [], []>} : vector<8x128xf32>, vector<128x512xf32>, vector<8x512xf32> -> vector<8x512xf32>
    %89 = arith.addf %87, %88 : vector<8x512xf32>
    %90 = vector.extract_strided_slice %89 {offsets = [0, 0], sizes = [8, 128], strides = [1, 1]} : vector<8x512xf32> to vector<8x128xf32>
    %91 = arith.negf %90 : vector<8x128xf32>
    %92 = math.exp %91 : vector<8x128xf32>
    %cst_28 = arith.constant 1.000000e+00 : f32
    %93 = vector.broadcast %cst_28 : f32 to vector<8x128xf32>
    %94 = arith.addf %93, %92 : vector<8x128xf32>
    %95 = arith.divf %93, %94 : vector<8x128xf32>
    %96 = vector.extract_strided_slice %89 {offsets = [0, 128], sizes = [8, 128], strides = [1, 1]} : vector<8x512xf32> to vector<8x128xf32>
    %97 = arith.negf %96 : vector<8x128xf32>
    %98 = math.exp %97 : vector<8x128xf32>
    %cst_29 = arith.constant 1.000000e+00 : f32
    %99 = vector.broadcast %cst_29 : f32 to vector<8x128xf32>
    %100 = arith.addf %99, %98 : vector<8x128xf32>
    %101 = arith.divf %99, %100 : vector<8x128xf32>
    %102 = vector.extract_strided_slice %89 {offsets = [0, 256], sizes = [8, 128], strides = [1, 1]} : vector<8x512xf32> to vector<8x128xf32>
    %103 = math.tanh %102 : vector<8x128xf32>
    %104 = vector.extract_strided_slice %89 {offsets = [0, 384], sizes = [8, 128], strides = [1, 1]} : vector<8x512xf32> to vector<8x128xf32>
    %105 = arith.negf %104 : vector<8x128xf32>
    %106 = math.exp %105 : vector<8x128xf32>
    %cst_30 = arith.constant 1.000000e+00 : f32
    %107 = vector.broadcast %cst_30 : f32 to vector<8x128xf32>
    %108 = arith.addf %107, %106 : vector<8x128xf32>
    %109 = arith.divf %107, %108 : vector<8x128xf32>
    %110 = arith.mulf %101, %75 : vector<8x128xf32>
    %111 = arith.mulf %95, %103 : vector<8x128xf32>
    %112 = arith.addf %110, %111 : vector<8x128xf32>
    %113 = math.tanh %112 : vector<8x128xf32>
    %114 = arith.mulf %109, %113 : vector<8x128xf32>
    %c1_i32_31 = arith.constant 1 : i32
    %115 = arith.addi %c2_i32, %c1_i32_31 : i32
    %116 = vector.broadcast %115 : i32 to vector<8x1xi32>
    %117 = arith.cmpi eq, %7, %116 : vector<8x1xi32>
    %118 = vector.shape_cast %117 : vector<8x1xi1> to vector<8x1xi1>
    %119 = vector.broadcast %118 : vector<8x1xi1> to vector<8x128xi1>
    %120 = arith.select %119, %114, %83 : vector<8x128xi1>, vector<8x128xf32>
    %c3_i32 = arith.constant 3 : i32
    %c8_i32_32 = arith.constant 8 : i32
    %121 = arith.muli %c3_i32, %c8_i32_32 : i32
    %122 = tpu.assume_multiple %121, 8 : i32
    %123 = arith.index_cast %122 : i32 to index
    %c0_33 = arith.constant 0 : index
    %124 = vector.load %arg10[%123, %c0_33] : memref<64x512xf32, #tpu.memory_space<vmem>>, vector<8x512xf32>
    %cst_34 = arith.constant dense<0.000000e+00> : vector<8x512xf32>
    %125 = tpu.matmul %114, %8, %cst_34 {dimension_numbers = #tpu.dot_dimension_numbers<[1], [0], [0], [1], [0, 0, 1, 1], [], []>} : vector<8x128xf32>, vector<128x512xf32>, vector<8x512xf32> -> vector<8x512xf32>
    %126 = arith.addf %124, %125 : vector<8x512xf32>
    %127 = vector.extract_strided_slice %126 {offsets = [0, 0], sizes = [8, 128], strides = [1, 1]} : vector<8x512xf32> to vector<8x128xf32>
    %128 = arith.negf %127 : vector<8x128xf32>
    %129 = math.exp %128 : vector<8x128xf32>
    %cst_35 = arith.constant 1.000000e+00 : f32
    %130 = vector.broadcast %cst_35 : f32 to vector<8x128xf32>
    %131 = arith.addf %130, %129 : vector<8x128xf32>
    %132 = arith.divf %130, %131 : vector<8x128xf32>
    %133 = vector.extract_strided_slice %126 {offsets = [0, 128], sizes = [8, 128], strides = [1, 1]} : vector<8x512xf32> to vector<8x128xf32>
    %134 = arith.negf %133 : vector<8x128xf32>
    %135 = math.exp %134 : vector<8x128xf32>
    %cst_36 = arith.constant 1.000000e+00 : f32
    %136 = vector.broadcast %cst_36 : f32 to vector<8x128xf32>
    %137 = arith.addf %136, %135 : vector<8x128xf32>
    %138 = arith.divf %136, %137 : vector<8x128xf32>
    %139 = vector.extract_strided_slice %126 {offsets = [0, 256], sizes = [8, 128], strides = [1, 1]} : vector<8x512xf32> to vector<8x128xf32>
    %140 = math.tanh %139 : vector<8x128xf32>
    %141 = vector.extract_strided_slice %126 {offsets = [0, 384], sizes = [8, 128], strides = [1, 1]} : vector<8x512xf32> to vector<8x128xf32>
    %142 = arith.negf %141 : vector<8x128xf32>
    %143 = math.exp %142 : vector<8x128xf32>
    %cst_37 = arith.constant 1.000000e+00 : f32
    %144 = vector.broadcast %cst_37 : f32 to vector<8x128xf32>
    %145 = arith.addf %144, %143 : vector<8x128xf32>
    %146 = arith.divf %144, %145 : vector<8x128xf32>
    %147 = arith.mulf %138, %112 : vector<8x128xf32>
    %148 = arith.mulf %132, %140 : vector<8x128xf32>
    %149 = arith.addf %147, %148 : vector<8x128xf32>
    %150 = math.tanh %149 : vector<8x128xf32>
    %151 = arith.mulf %146, %150 : vector<8x128xf32>
    %c1_i32_38 = arith.constant 1 : i32
    %152 = arith.addi %c3_i32, %c1_i32_38 : i32
    %153 = vector.broadcast %152 : i32 to vector<8x1xi32>
    %154 = arith.cmpi eq, %7, %153 : vector<8x1xi32>
    %155 = vector.shape_cast %154 : vector<8x1xi1> to vector<8x1xi1>
    %156 = vector.broadcast %155 : vector<8x1xi1> to vector<8x128xi1>
    %157 = arith.select %156, %151, %120 : vector<8x128xi1>, vector<8x128xf32>
    %c4_i32 = arith.constant 4 : i32
    %c8_i32_39 = arith.constant 8 : i32
    %158 = arith.muli %c4_i32, %c8_i32_39 : i32
    %159 = tpu.assume_multiple %158, 8 : i32
    %160 = arith.index_cast %159 : i32 to index
    %c0_40 = arith.constant 0 : index
    %161 = vector.load %arg10[%160, %c0_40] : memref<64x512xf32, #tpu.memory_space<vmem>>, vector<8x512xf32>
    %cst_41 = arith.constant dense<0.000000e+00> : vector<8x512xf32>
    %162 = tpu.matmul %151, %8, %cst_41 {dimension_numbers = #tpu.dot_dimension_numbers<[1], [0], [0], [1], [0, 0, 1, 1], [], []>} : vector<8x128xf32>, vector<128x512xf32>, vector<8x512xf32> -> vector<8x512xf32>
    %163 = arith.addf %161, %162 : vector<8x512xf32>
    %164 = vector.extract_strided_slice %163 {offsets = [0, 0], sizes = [8, 128], strides = [1, 1]} : vector<8x512xf32> to vector<8x128xf32>
    %165 = arith.negf %164 : vector<8x128xf32>
    %166 = math.exp %165 : vector<8x128xf32>
    %cst_42 = arith.constant 1.000000e+00 : f32
    %167 = vector.broadcast %cst_42 : f32 to vector<8x128xf32>
    %168 = arith.addf %167, %166 : vector<8x128xf32>
    %169 = arith.divf %167, %168 : vector<8x128xf32>
    %170 = vector.extract_strided_slice %163 {offsets = [0, 128], sizes = [8, 128], strides = [1, 1]} : vector<8x512xf32> to vector<8x128xf32>
    %171 = arith.negf %170 : vector<8x128xf32>
    %172 = math.exp %171 : vector<8x128xf32>
    %cst_43 = arith.constant 1.000000e+00 : f32
    %173 = vector.broadcast %cst_43 : f32 to vector<8x128xf32>
    %174 = arith.addf %173, %172 : vector<8x128xf32>
    %175 = arith.divf %173, %174 : vector<8x128xf32>
    %176 = vector.extract_strided_slice %163 {offsets = [0, 256], sizes = [8, 128], strides = [1, 1]} : vector<8x512xf32> to vector<8x128xf32>
    %177 = math.tanh %176 : vector<8x128xf32>
    %178 = vector.extract_strided_slice %163 {offsets = [0, 384], sizes = [8, 128], strides = [1, 1]} : vector<8x512xf32> to vector<8x128xf32>
    %179 = arith.negf %178 : vector<8x128xf32>
    %180 = math.exp %179 : vector<8x128xf32>
    %cst_44 = arith.constant 1.000000e+00 : f32
    %181 = vector.broadcast %cst_44 : f32 to vector<8x128xf32>
    %182 = arith.addf %181, %180 : vector<8x128xf32>
    %183 = arith.divf %181, %182 : vector<8x128xf32>
    %184 = arith.mulf %175, %149 : vector<8x128xf32>
    %185 = arith.mulf %169, %177 : vector<8x128xf32>
    %186 = arith.addf %184, %185 : vector<8x128xf32>
    %187 = math.tanh %186 : vector<8x128xf32>
    %188 = arith.mulf %183, %187 : vector<8x128xf32>
    %c1_i32_45 = arith.constant 1 : i32
    %189 = arith.addi %c4_i32, %c1_i32_45 : i32
    %190 = vector.broadcast %189 : i32 to vector<8x1xi32>
    %191 = arith.cmpi eq, %7, %190 : vector<8x1xi32>
    %192 = vector.shape_cast %191 : vector<8x1xi1> to vector<8x1xi1>
    %193 = vector.broadcast %192 : vector<8x1xi1> to vector<8x128xi1>
    %194 = arith.select %193, %188, %157 : vector<8x128xi1>, vector<8x128xf32>
    %c5_i32 = arith.constant 5 : i32
    %c8_i32_46 = arith.constant 8 : i32
    %195 = arith.muli %c5_i32, %c8_i32_46 : i32
    %196 = tpu.assume_multiple %195, 8 : i32
    %197 = arith.index_cast %196 : i32 to index
    %c0_47 = arith.constant 0 : index
    %198 = vector.load %arg10[%197, %c0_47] : memref<64x512xf32, #tpu.memory_space<vmem>>, vector<8x512xf32>
    %cst_48 = arith.constant dense<0.000000e+00> : vector<8x512xf32>
    %199 = tpu.matmul %188, %8, %cst_48 {dimension_numbers = #tpu.dot_dimension_numbers<[1], [0], [0], [1], [0, 0, 1, 1], [], []>} : vector<8x128xf32>, vector<128x512xf32>, vector<8x512xf32> -> vector<8x512xf32>
    %200 = arith.addf %198, %199 : vector<8x512xf32>
    %201 = vector.extract_strided_slice %200 {offsets = [0, 0], sizes = [8, 128], strides = [1, 1]} : vector<8x512xf32> to vector<8x128xf32>
    %202 = arith.negf %201 : vector<8x128xf32>
    %203 = math.exp %202 : vector<8x128xf32>
    %cst_49 = arith.constant 1.000000e+00 : f32
    %204 = vector.broadcast %cst_49 : f32 to vector<8x128xf32>
    %205 = arith.addf %204, %203 : vector<8x128xf32>
    %206 = arith.divf %204, %205 : vector<8x128xf32>
    %207 = vector.extract_strided_slice %200 {offsets = [0, 128], sizes = [8, 128], strides = [1, 1]} : vector<8x512xf32> to vector<8x128xf32>
    %208 = arith.negf %207 : vector<8x128xf32>
    %209 = math.exp %208 : vector<8x128xf32>
    %cst_50 = arith.constant 1.000000e+00 : f32
    %210 = vector.broadcast %cst_50 : f32 to vector<8x128xf32>
    %211 = arith.addf %210, %209 : vector<8x128xf32>
    %212 = arith.divf %210, %211 : vector<8x128xf32>
    %213 = vector.extract_strided_slice %200 {offsets = [0, 256], sizes = [8, 128], strides = [1, 1]} : vector<8x512xf32> to vector<8x128xf32>
    %214 = math.tanh %213 : vector<8x128xf32>
    %215 = vector.extract_strided_slice %200 {offsets = [0, 384], sizes = [8, 128], strides = [1, 1]} : vector<8x512xf32> to vector<8x128xf32>
    %216 = arith.negf %215 : vector<8x128xf32>
    %217 = math.exp %216 : vector<8x128xf32>
    %cst_51 = arith.constant 1.000000e+00 : f32
    %218 = vector.broadcast %cst_51 : f32 to vector<8x128xf32>
    %219 = arith.addf %218, %217 : vector<8x128xf32>
    %220 = arith.divf %218, %219 : vector<8x128xf32>
    %221 = arith.mulf %212, %186 : vector<8x128xf32>
    %222 = arith.mulf %206, %214 : vector<8x128xf32>
    %223 = arith.addf %221, %222 : vector<8x128xf32>
    %224 = math.tanh %223 : vector<8x128xf32>
    %225 = arith.mulf %220, %224 : vector<8x128xf32>
    %c1_i32_52 = arith.constant 1 : i32
    %226 = arith.addi %c5_i32, %c1_i32_52 : i32
    %227 = vector.broadcast %226 : i32 to vector<8x1xi32>
    %228 = arith.cmpi eq, %7, %227 : vector<8x1xi32>
    %229 = vector.shape_cast %228 : vector<8x1xi1> to vector<8x1xi1>
    %230 = vector.broadcast %229 : vector<8x1xi1> to vector<8x128xi1>
    %231 = arith.select %230, %225, %194 : vector<8x128xi1>, vector<8x128xf32>
    %c6_i32 = arith.constant 6 : i32
    %c8_i32_53 = arith.constant 8 : i32
    %232 = arith.muli %c6_i32, %c8_i32_53 : i32
    %233 = tpu.assume_multiple %232, 8 : i32
    %234 = arith.index_cast %233 : i32 to index
    %c0_54 = arith.constant 0 : index
    %235 = vector.load %arg10[%234, %c0_54] : memref<64x512xf32, #tpu.memory_space<vmem>>, vector<8x512xf32>
    %cst_55 = arith.constant dense<0.000000e+00> : vector<8x512xf32>
    %236 = tpu.matmul %225, %8, %cst_55 {dimension_numbers = #tpu.dot_dimension_numbers<[1], [0], [0], [1], [0, 0, 1, 1], [], []>} : vector<8x128xf32>, vector<128x512xf32>, vector<8x512xf32> -> vector<8x512xf32>
    %237 = arith.addf %235, %236 : vector<8x512xf32>
    %238 = vector.extract_strided_slice %237 {offsets = [0, 0], sizes = [8, 128], strides = [1, 1]} : vector<8x512xf32> to vector<8x128xf32>
    %239 = arith.negf %238 : vector<8x128xf32>
    %240 = math.exp %239 : vector<8x128xf32>
    %cst_56 = arith.constant 1.000000e+00 : f32
    %241 = vector.broadcast %cst_56 : f32 to vector<8x128xf32>
    %242 = arith.addf %241, %240 : vector<8x128xf32>
    %243 = arith.divf %241, %242 : vector<8x128xf32>
    %244 = vector.extract_strided_slice %237 {offsets = [0, 128], sizes = [8, 128], strides = [1, 1]} : vector<8x512xf32> to vector<8x128xf32>
    %245 = arith.negf %244 : vector<8x128xf32>
    %246 = math.exp %245 : vector<8x128xf32>
    %cst_57 = arith.constant 1.000000e+00 : f32
    %247 = vector.broadcast %cst_57 : f32 to vector<8x128xf32>
    %248 = arith.addf %247, %246 : vector<8x128xf32>
    %249 = arith.divf %247, %248 : vector<8x128xf32>
    %250 = vector.extract_strided_slice %237 {offsets = [0, 256], sizes = [8, 128], strides = [1, 1]} : vector<8x512xf32> to vector<8x128xf32>
    %251 = math.tanh %250 : vector<8x128xf32>
    %252 = vector.extract_strided_slice %237 {offsets = [0, 384], sizes = [8, 128], strides = [1, 1]} : vector<8x512xf32> to vector<8x128xf32>
    %253 = arith.negf %252 : vector<8x128xf32>
    %254 = math.exp %253 : vector<8x128xf32>
    %cst_58 = arith.constant 1.000000e+00 : f32
    %255 = vector.broadcast %cst_58 : f32 to vector<8x128xf32>
    %256 = arith.addf %255, %254 : vector<8x128xf32>
    %257 = arith.divf %255, %256 : vector<8x128xf32>
    %258 = arith.mulf %249, %223 : vector<8x128xf32>
    %259 = arith.mulf %243, %251 : vector<8x128xf32>
    %260 = arith.addf %258, %259 : vector<8x128xf32>
    %261 = math.tanh %260 : vector<8x128xf32>
    %262 = arith.mulf %257, %261 : vector<8x128xf32>
    %c1_i32_59 = arith.constant 1 : i32
    %263 = arith.addi %c6_i32, %c1_i32_59 : i32
    %264 = vector.broadcast %263 : i32 to vector<8x1xi32>
    %265 = arith.cmpi eq, %7, %264 : vector<8x1xi32>
    %266 = vector.shape_cast %265 : vector<8x1xi1> to vector<8x1xi1>
    %267 = vector.broadcast %266 : vector<8x1xi1> to vector<8x128xi1>
    %268 = arith.select %267, %262, %231 : vector<8x128xi1>, vector<8x128xf32>
    %c7_i32 = arith.constant 7 : i32
    %c8_i32_60 = arith.constant 8 : i32
    %269 = arith.muli %c7_i32, %c8_i32_60 : i32
    %270 = tpu.assume_multiple %269, 8 : i32
    %271 = arith.index_cast %270 : i32 to index
    %c0_61 = arith.constant 0 : index
    %272 = vector.load %arg10[%271, %c0_61] : memref<64x512xf32, #tpu.memory_space<vmem>>, vector<8x512xf32>
    %cst_62 = arith.constant dense<0.000000e+00> : vector<8x512xf32>
    %273 = tpu.matmul %262, %8, %cst_62 {dimension_numbers = #tpu.dot_dimension_numbers<[1], [0], [0], [1], [0, 0, 1, 1], [], []>} : vector<8x128xf32>, vector<128x512xf32>, vector<8x512xf32> -> vector<8x512xf32>
    %274 = arith.addf %272, %273 : vector<8x512xf32>
    %275 = vector.extract_strided_slice %274 {offsets = [0, 0], sizes = [8, 128], strides = [1, 1]} : vector<8x512xf32> to vector<8x128xf32>
    %276 = arith.negf %275 : vector<8x128xf32>
    %277 = math.exp %276 : vector<8x128xf32>
    %cst_63 = arith.constant 1.000000e+00 : f32
    %278 = vector.broadcast %cst_63 : f32 to vector<8x128xf32>
    %279 = arith.addf %278, %277 : vector<8x128xf32>
    %280 = arith.divf %278, %279 : vector<8x128xf32>
    %281 = vector.extract_strided_slice %274 {offsets = [0, 128], sizes = [8, 128], strides = [1, 1]} : vector<8x512xf32> to vector<8x128xf32>
    %282 = arith.negf %281 : vector<8x128xf32>
    %283 = math.exp %282 : vector<8x128xf32>
    %cst_64 = arith.constant 1.000000e+00 : f32
    %284 = vector.broadcast %cst_64 : f32 to vector<8x128xf32>
    %285 = arith.addf %284, %283 : vector<8x128xf32>
    %286 = arith.divf %284, %285 : vector<8x128xf32>
    %287 = vector.extract_strided_slice %274 {offsets = [0, 256], sizes = [8, 128], strides = [1, 1]} : vector<8x512xf32> to vector<8x128xf32>
    %288 = math.tanh %287 : vector<8x128xf32>
    %289 = vector.extract_strided_slice %274 {offsets = [0, 384], sizes = [8, 128], strides = [1, 1]} : vector<8x512xf32> to vector<8x128xf32>
    %290 = arith.negf %289 : vector<8x128xf32>
    %291 = math.exp %290 : vector<8x128xf32>
    %cst_65 = arith.constant 1.000000e+00 : f32
    %292 = vector.broadcast %cst_65 : f32 to vector<8x128xf32>
    %293 = arith.addf %292, %291 : vector<8x128xf32>
    %294 = arith.divf %292, %293 : vector<8x128xf32>
    %295 = arith.mulf %286, %260 : vector<8x128xf32>
    %296 = arith.mulf %280, %288 : vector<8x128xf32>
    %297 = arith.addf %295, %296 : vector<8x128xf32>
    %298 = math.tanh %297 : vector<8x128xf32>
    %299 = arith.mulf %294, %298 : vector<8x128xf32>
    %c1_i32_66 = arith.constant 1 : i32
    %300 = arith.addi %c7_i32, %c1_i32_66 : i32
    %301 = vector.broadcast %300 : i32 to vector<8x1xi32>
    %302 = arith.cmpi eq, %7, %301 : vector<8x1xi32>
    %303 = vector.shape_cast %302 : vector<8x1xi1> to vector<8x1xi1>
    %304 = vector.broadcast %303 : vector<8x1xi1> to vector<8x128xi1>
    %305 = arith.select %304, %299, %268 : vector<8x128xi1>, vector<8x128xf32>
    %c8_i32_67 = arith.constant 8 : i32
    %c0_68 = arith.constant 0 : index
    %c0_69 = arith.constant 0 : index
    %306 = vector.load %arg8[%c0_68, %c0_69] : memref<8x128xf32, #tpu.memory_space<vmem>>, vector<8x128xf32>
    tpu.vector_store %arg8[%c0_68, %c0_69], %305 {strides = array<i32>} : memref<8x128xf32, #tpu.memory_space<vmem>>, vector<8x128xf32>,
    %c0_70 = arith.constant 0 : index
    %c0_71 = arith.constant 0 : index
    %307 = vector.load %arg6[%c0_70, %c0_71] : memref<128x128xf32, #tpu.memory_space<vmem>>, vector<128x128xf32>
    %cst_72 = arith.constant dense<0.000000e+00> : vector<8x128xf32>
    %308 = tpu.matmul %305, %307, %cst_72 {dimension_numbers = #tpu.dot_dimension_numbers<[1], [0], [0], [1], [0, 0, 1, 1], [], []>} : vector<8x128xf32>, vector<128x128xf32>, vector<8x128xf32> -> vector<8x128xf32>
    %c0_73 = arith.constant 0 : index
    %c0_74 = arith.constant 0 : index
    %309 = vector.load %arg7[%c0_73, %c0_74] : memref<1x128xf32, #tpu.memory_space<vmem>>, vector<1x128xf32>
    %310 = vector.broadcast %309 : vector<1x128xf32> to vector<8x128xf32>
    %311 = arith.addf %308, %310 : vector<8x128xf32>
    %cst_75 = arith.constant dense<0xFF800000> : vector<8xf32>
    %312 = vector.multi_reduction <maximumf>, %311, %cst_75 [1] : vector<8x128xf32> to vector<8xf32>
    %313 = vector.shape_cast %312 : vector<8xf32> to vector<8x1xf32>
    %314 = vector.broadcast %313 : vector<8x1xf32> to vector<8x128xf32>
    %315 = arith.subf %311, %314 : vector<8x128xf32>
    %316 = math.exp %315 : vector<8x128xf32>
    %cst_76 = arith.constant dense<0.000000e+00> : vector<8xf32>
    %317 = vector.multi_reduction <add>, %316, %cst_76 [1] : vector<8x128xf32> to vector<8xf32>
    %318 = vector.shape_cast %317 : vector<8xf32> to vector<8x1xf32>
    %319 = math.log %318 : vector<8x1xf32>
    %320 = arith.addf %313, %319 : vector<8x1xf32>
    %321 = vector.broadcast %320 : vector<8x1xf32> to vector<8x128xf32>
    %322 = arith.subf %311, %321 : vector<8x128xf32>
    %c0_77 = arith.constant 0 : index
    %c0_78 = arith.constant 0 : index
    %323 = vector.load %arg9[%c0_77, %c0_78] : memref<8x128xf32, #tpu.memory_space<vmem>>, vector<8x128xf32>
    tpu.vector_store %arg9[%c0_77, %c0_78], %322 {strides = array<i32>} : memref<8x128xf32, #tpu.memory_space<vmem>>, vector<8x128xf32>,
    return
  }
  func.func @transform_0(%arg0: i32) -> (i32, i32) {
    %c0_i32 = arith.constant 0 : i32
    %c0_i32_0 = arith.constant 0 : i32
    %c0_i32_1 = arith.constant 0 : i32
    return %c0_i32, %c0_i32_0 : i32, i32
  }
  func.func @transform_1(%arg0: i32) -> (i32, i32) {
    %c0_i32 = arith.constant 0 : i32
    %c0_i32_0 = arith.constant 0 : i32
    %c0_i32_1 = arith.constant 0 : i32
    return %c0_i32, %c0_i32_0 : i32, i32
  }
  func.func @transform_2(%arg0: i32) -> (i32, i32) {
    %c0_i32 = arith.constant 0 : i32
    %c0_i32_0 = arith.constant 0 : i32
    %c0_i32_1 = arith.constant 0 : i32
    return %c0_i32, %c0_i32_0 : i32, i32
  }
  func.func @transform_3(%arg0: i32) -> (i32, i32) {
    %c0_i32 = arith.constant 0 : i32
    %c0_i32_0 = arith.constant 0 : i32
    %c0_i32_1 = arith.constant 0 : i32
    return %c0_i32, %c0_i32_0 : i32, i32
  }
  func.func @transform_4(%arg0: i32) -> (i32, i32) {
    %c0_i32 = arith.constant 0 : i32
    %c0_i32_0 = arith.constant 0 : i32
    %c0_i32_1 = arith.constant 0 : i32
    return %c0_i32, %c0_i32_0 : i32, i32
  }
  func.func @transform_5(%arg0: i32) -> (i32, i32) {
    %c0_i32 = arith.constant 0 : i32
    %c0_i32_0 = arith.constant 0 : i32
    %c0_i32_1 = arith.constant 0 : i32
    return %c0_i32, %c0_i32_0 : i32, i32
  }
  func.func @transform_6(%arg0: i32) -> (i32, i32) {
    %c0_i32 = arith.constant 0 : i32
    %c0_i32_0 = arith.constant 0 : i32
    %c0_i32_1 = arith.constant 0 : i32
    return %c0_i32, %c0_i32_0 : i32, i32
  }
  func.func @transform_7(%arg0: i32) -> (i32, i32) {
    %c0_i32 = arith.constant 0 : i32
    %c0_i32_0 = arith.constant 0 : i32
    %c0_i32_1 = arith.constant 0 : i32
    return %c0_i32, %c0_i32_0 : i32, i32
  }
  func.func @transform_8(%arg0: i32) -> (i32, i32) {
    %c0_i32 = arith.constant 0 : i32
    %c0_i32_0 = arith.constant 0 : i32
    %c0_i32_1 = arith.constant 0 : i32
    return %c0_i32, %c0_i32_0 : i32, i32
  }
}

</mosaic_0001>

<bundles_post_ra>
// kernel: tpu_custom_call.1
= control target key start
LH: loop header
LB: loop body
LE: loop exit
PB: predicated region body
PF: predicated region fallthrough
CT: control target
= control target key end

     0   :  { %14 = vsyncpa [#allocation4], 0  ;;  %s3697_s0 = inlined_call_operand.vmem [shape: f32[64,32], index: 0, kind: input, shape index: {}]   ;;  %s3698_s1 = inlined_call_operand.vmem [shape: s32[8,1], index: 1, kind: input, shape index: {}]   ;;  %s3699_s2 = inlined_call_operand.hbm [shape: f32[32,512], index: 2, kind: input, shape index: {}]   ;;  %s3700_s3 = inlined_call_operand.hbm [shape: f32[128,512], index: 3, kind: input, shape index: {}]   ;;  %s3701_s4 = inlined_call_operand.vmem [shape: f32[1,512], index: 4, kind: input, shape index: {}]   ;;  %s3702_s5 = inlined_call_operand.hbm [shape: f32[128,128], index: 5, kind: input, shape index: {}]   ;;  %s3703_s6 = inlined_call_operand.vmem [shape: f32[1,128], index: 6, kind: input, shape index: {}]   ;;  %s3704_s7 = inlined_call_operand.hbm [shape: f32[8,128], index: 7, kind: output, shape index: {0}]   ;;  %s3705_s8 = inlined_call_operand.hbm [shape: f32[8,128], index: 8, kind: output, shape index: {1}]  }
   0x1   :  { %15 = vsyncpa [#allocation7], 0 }
   0x2   :  { %16 = vsyncpa [#allocation5], 0 }
   0x3   :  { %17 = vsyncpa [#allocation11], 0  ;;  %s3055_s27 = smov [#allocation6]   ;;  %s3056_s29 = smov [#allocation3]  }
   0x4   :  { %s39_s28 = sshll.u32 %s3055_s27, 4  ;;  %s27_s30 = sshll.u32 %s3056_s29, 4  ;;  %s40_s28 = int_to_ptr.vmem [resolvable:$true] %s39_s28  ;;  %s3113_s30 = int_to_ptr.vmem [resolvable:$true] %s27_s30 }
   0x5   :  { %s2937_s11 = scalar_lea.hbm %s3700_s3, 8192 }
   0x6   :  { %p2938_p0 = scmp.ne.s32.totalorder %s3700_s3, %s2937_s11  ;;  %p2941_p1 = scmp.lt.u32.totalorder %s2937_s11, %s3700_s3 }
   0x8   :  { %p2943_p2 = pnand %p2941_p1, %p2938_p0 }
   0xa   :  { %2946 = shalt.err (!%p2943_p2)
}
   0xb   :  { %s2947_s16 = scalar_lea.vmem %s40_s28, 8192  ;;  %p2952_p4 = scmp.lt.s32.totalorder %s40_s28, %s40_s28 }
   0xc   :  { %p2948_p3 = scmp.ne.s32.totalorder %s40_s28, %s2947_s16  ;;  %p2953_p5 = scmp.lt.s32.totalorder %s2947_s16, %s2947_s16 }
   0xe   :  { %p2954_p6 = por %p2953_p5, %p2952_p4 }
  0x10   :  { %p2955_p7 = pnand %p2954_p6, %p2948_p3 }
  0x12   :  { %2958 = shalt.err (!%p2955_p7)
}
  0x13   :  { %s3057_s17 = smov 512   ;;  %s3058_s18 = smov 32  }
  0x14   :  { %45 = dma.hbm_to_vmem [thread:$0]  %s3700_s3, 8192, %s40_s28, [#allocation7], %s3057_s17, %s3057_s17, %s3058_s18  }
  0x15   :  { %s2959_s23 = scalar_lea.hbm %s3699_s2, 2048 }
  0x16   :  { %p2960_p8 = scmp.ne.s32.totalorder %s3699_s2, %s2959_s23  ;;  %p2963_p9 = scmp.lt.u32.totalorder %s2959_s23, %s3699_s2 }
  0x18   :  { %p2965_p10 = pnand %p2963_p9, %p2960_p8 }
  0x1a   :  { %2968 = shalt.err (!%p2965_p10)
}
  0x1b   :  { %s2969_s29 = scalar_lea.vmem %s3113_s30, 2048  ;;  %p2974_p12 = scmp.lt.s32.totalorder %s3113_s30, %s3113_s30 }
  0x1c   :  { %p2970_p11 = scmp.ne.s32.totalorder %s3113_s30, %s2969_s29  ;;  %p2975_p13 = scmp.lt.s32.totalorder %s2969_s29, %s2969_s29 }
  0x1e   :  { %p2976_p0 = por %p2975_p13, %p2974_p12 }
  0x20   :  { %p2977_p1 = pnand %p2976_p0, %p2970_p11 }
  0x22   :  { %2980 = shalt.err (!%p2977_p1)
}
  0x23   :  { %33 = dma.hbm_to_vmem [thread:$0]  %s3699_s2, 2048, %s3113_s30, [#allocation4], %s3057_s17, %s3057_s17, %s3058_s18  }
  0x24   :  { %s3059_s9 = smov [#allocation8]   ;;  %s2981_s13 = scalar_lea.hbm %s3702_s5, 2048 }
  0x25   :  { %s53_s10 = sshll.u32 %s3059_s9, 4  ;;  %p2982_p2 = scmp.ne.s32.totalorder %s3702_s5, %s2981_s13  ;;  %s54_s10 = int_to_ptr.vmem [resolvable:$true] %s53_s10 }
  0x26   :  { %p2985_p3 = scmp.lt.u32.totalorder %s2981_s13, %s3702_s5 }
  0x28   :  { %p2987_p4 = pnand %p2985_p3, %p2982_p2 }
  0x2a   :  { %2990 = shalt.err (!%p2987_p4)
}
  0x2b   :  { %s2991_s20 = scalar_lea.vmem %s54_s10, 2048  ;;  %p2996_p6 = scmp.lt.s32.totalorder %s54_s10, %s54_s10 }
  0x2c   :  { %p2992_p5 = scmp.ne.s32.totalorder %s54_s10, %s2991_s20  ;;  %p2997_p7 = scmp.lt.s32.totalorder %s2991_s20, %s2991_s20 }
  0x2e   :  { %p2998_p8 = por %p2997_p7, %p2996_p6 }
  0x30   :  { %p2999_p9 = pnand %p2998_p8, %p2992_p5 }
  0x32   :  { %3002 = shalt.err (!%p2999_p9)
}
  0x33   :  { %s3060_s2 = smov 128   ;;  %s3061_s30 = smov 8  }
  0x34   :  { %59 = dma.hbm_to_vmem [thread:$0]  %s3702_s5, 2048, %s54_s10, [#allocation7], %s3060_s2, %s3060_s2, %s3061_s30  }
  0x35   :  { %3047 = dma.done.wait [#allocation4], 2048  }
  0x36   :  { %3048 = vsyncadd [#allocation4], 4294965248 }
  0x37   :  { %3049 = dma.done.wait [#allocation7], 10240  }
  0x38   :  { %3050 = vsyncadd [#allocation7], 4294957056  ;;  %v3062_v0 = vmov 0.0   ;;  %v3063_v1 = vmov 0   ;;  %v80_v2 = vld [vmem:[#allocation3 + $0x8] sm:$0xff]  ;;  %v82_v4 = vld [vmem:[#allocation3 + $0x18] sm:$0xff] }
  0x39   :  { %206 = vmatprep.mubr.f32.mxu0 %v3062_v0  ;;  %319 = vmatprep.mubr.f32.mxu1 %v3062_v0  ;;  %v84_v3 = vld [vmem:[#allocation3 + $0x28] sm:$0xff]  ;;  %v86_v6 = vld [vmem:[#allocation3 + $0x38] sm:$0xff]  ;;  %v79_v7 = vld [vmem:[#allocation3] sm:$0xff]  ;;  %vm117_vm0 = vcmask 261120   ;;  %s3066_s2 = smov [#allocation9]  }
  0x3a   :  { %2802 = vset.pattern.permute.xlu0 %v3063_v1  ;;  %2803 = vset.pattern.permute.xlu1 %v3063_v1  ;;  %v2173_v5 = vpack.c.bf16 %v84_v3, %v80_v2  ;;  %v83_v8 = vld [vmem:[#allocation3 + $0x20] sm:$0xff]  ;;  %v2181_v9 = vpack.c.bf16 %v86_v6, %v82_v4  ;;  %v81_v11 = vld [vmem:[#allocation3 + $0x10] sm:$0xff]  ;;  %v88_v13 = vld [vmem:[#allocation3 + $0x48] sm:$0xff]  ;;  %s2049_s30 = sshll.u32 %s3066_s2, 4  ;;  %s2050_s30 = int_to_ptr.vmem [resolvable:$true] %s2049_s30 }
  0x3b   :  { %v2175_v10 = vpack.c.bf16 %v83_v8, %v79_v7  ;;  %v85_v12 = vld [vmem:[#allocation3 + $0x30] sm:$0xff]  ;;  %v92_v15 = vld [vmem:[#allocation3 + $0x68] sm:$0xff]  ;;  %v90_v16 = vld [vmem:[#allocation3 + $0x58] sm:$0xff]  ;;  %s3003_s17 = scalar_lea.vmem %s2050_s30, 128  ;;  %p3008_p11 = scmp.lt.s32.totalorder %s2050_s30, %s2050_s30 }
  0x3c   :  { %2174 = vmatprep.subr.bf16.mxu0 %v2173_v5  ;;  %v2183_v14 = vpack.c.bf16 %v85_v12, %v81_v11  ;;  %v94_v17 = vld [vmem:[#allocation3 + $0x78] sm:$0xff]  ;;  %2182 = vmatprep.subr.bf16.mxu1 %v2181_v9  ;;  %v2177_v18 = vpack.c.bf16 %v92_v15, %v88_v13  ;;  %v87_v20 = vld [vmem:[#allocation3 + $0x40] sm:$0xff]  ;;  %v89_v22 = vld [vmem:[#allocation3 + $0x50] sm:$0xff]  ;;  %p3004_p10 = scmp.ne.s32.totalorder %s2050_s30, %s3003_s17  ;;  %p3009_p12 = scmp.lt.s32.totalorder %s3003_s17, %s3003_s17 }
  0x3d   :  { %2176 = vmatpush1.bf16.msra.mxu0 %v2175_v10  ;;  %v2185_v19 = vpack.c.bf16 %v94_v17, %v90_v16  ;;  %v91_v21 = vld [vmem:[#allocation3 + $0x60] sm:$0xff]  ;;  %v93_v24 = vld [vmem:[#allocation3 + $0x70] sm:$0xff]  ;;  %v402_v25 = vld [vmem:[#allocation6 + $0x8] sm:$0xff] }
  0x3e   :  { %2184 = vmatpush1.bf16.msra.mxu1 %v2183_v14  ;;  %v2179_v23 = vpack.c.bf16 %v91_v21, %v87_v20  ;;  %2178 = vmatprep.subr.bf16.mxu0 %v2177_v18  ;;  %v2187_v26 = vpack.c.bf16 %v93_v24, %v89_v22  ;;  %v406_v27 = vld [vmem:[#allocation6 + $0x28] sm:$0xff]  ;;  %v404_v28 = vld [vmem:[#allocation6 + $0x18] sm:$0xff]  ;;  %v401_v32 = vld [vmem:[#allocation6] sm:$0xff]  ;;  %p3010_p13 = por %p3009_p12, %p3008_p11 }
  0x3f   :  { %2186 = vmatprep.subr.bf16.mxu1 %v2185_v19  ;;  %v408_v29 = vld [vmem:[#allocation6 + $0x38] sm:$0xff]  ;;  %v3160_v30 = vpack.c.bf16 %v406_v27, %v402_v25  ;;  %v405_v33 = vld [vmem:[#allocation6 + $0x20] sm:$0xff]  ;;  %v403_v34 = vld [vmem:[#allocation6 + $0x10] sm:$0xff] }
  0x40   :  { %v3162_v31 = vpack.c.bf16 %v408_v29, %v404_v28  ;;  %v71_v35 = vld [vmem:[%s3697_s0] sm:$0xff]  ;;  %v3167_v36 = vpack.c.bf16 %v405_v33, %v401_v32  ;;  %v407_v37 = vld [vmem:[#allocation6 + $0x30] sm:$0xff]  ;;  %v410_v38 = vld [vmem:[#allocation6 + $0x48] sm:$0xff]  ;;  %p3011_p0 = pnand %p3010_p13, %p3004_p10 }
  0x41   :  { %2180 = vmatpush1.bf16.msra.mxu0 %v2179_v23  ;;  %v3170_v39 = vpack.c.bf16 %v407_v37, %v403_v34  ;;  %v414_v40 = vld [vmem:[#allocation6 + $0x68] sm:$0xff]  ;;  %v412_v41 = vld [vmem:[#allocation6 + $0x58] sm:$0xff]  ;;  %v409_v44 = vld [vmem:[#allocation6 + $0x40] sm:$0xff] }
  0x42   :  { %2188 = vmatpush1.bf16.msra.mxu1 %v2187_v26  ;;  %2190 = vmatprep.subr.bf16.mxu0 %v3160_v30  ;;  %v416_v42 = vld [vmem:[#allocation6 + $0x78] sm:$0xff]  ;;  %v3173_v43 = vpack.c.bf16 %v414_v40, %v410_v38  ;;  %v413_v45 = vld [vmem:[#allocation6 + $0x60] sm:$0xff]  ;;  %v411_v46 = vld [vmem:[#allocation6 + $0x50] sm:$0xff] }
  0x43   :  { %2222 = vmatprep.subr.bf16.mxu1 %v3162_v31  ;;  %v72_v47 = vld [vmem:[%s3697_s0 + $0x8] sm:$0xff]  ;;  %v3179_v48 = vpack.c.bf16 %v416_v42, %v412_v41  ;;  %v415_v49 = vld [vmem:[#allocation6 + $0x70] sm:$0xff]  ;;  %v3183_v51 = vpack.c.bf16 %v413_v45, %v409_v44  ;;  %v420_v53 = vld [vmem:[#allocation6 + $0x98] sm:$0xff] }
  0x44   :  { %2080 = vmatmul.mubr.msk.f32.vlgmr.msra.gmra.mrb[0].mxu0 %vm117_vm0, %v71_v35  ;;  %v418_v50 = vld [vmem:[#allocation6 + $0x88] sm:$0xff]  ;;  %v424_v54 = vld [vmem:[#allocation6 + $0xb8] sm:$0xff]  ;;  %v3187_v55 = vpack.c.bf16 %v415_v49, %v411_v46  ;;  %v417_v56 = vld [vmem:[#allocation6 + $0x80] sm:$0xff] }
  0x45   :  { %2088 = vmatmul.mubr.msk.f32.vlgmr.msra.gmra.mrb[0].mxu1 %vm117_vm0, %v71_v35  ;;  %2192 = vmatpush1.bf16.msra.mxu0 %v3167_v36  ;;  %v422_v52 = vld [vmem:[#allocation6 + $0xa8] sm:$0xff]  ;;  %v421_v57 = vld [vmem:[#allocation6 + $0xa0] sm:$0xff]  ;;  %v419_v59 = vld [vmem:[#allocation6 + $0x90] sm:$0xff]  ;;  %v3195_v61 = vpack.c.bf16 %v424_v54, %v420_v53 }
  0x46   :  { %2224 = vmatpush1.bf16.msra.mxu1 %v3170_v39  ;;  %212 = vmatprep.mubr.f32.mxu0 %v3062_v0  ;;  %v3191_v58 = vpack.c.bf16 %v422_v52, %v418_v50  ;;  %v423_v60 = vld [vmem:[#allocation6 + $0xb0] sm:$0xff]  ;;  %v426_v62 = vld [vmem:[#allocation6 + $0xc8] sm:$0xff]  ;;  %v3202_v3 = vpack.c.bf16 %v421_v57, %v417_v56  ;;  %v428_v4 = vld [vmem:[#allocation6 + $0xd8] sm:$0xff] }
  0x47   :  { %325 = vmatprep.mubr.f32.mxu1 %v3062_v0  ;;  %2194 = vmatprep.subr.bf16.mxu0 %v3173_v43  ;;  %v430_v63 = vld [vmem:[#allocation6 + $0xe8] sm:$0xff]  ;;  %v73_v2 = vld [vmem:[%s3697_s0 + $0x10] sm:$0xff]  ;;  %v432_v5 = vld [vmem:[#allocation6 + $0xf8] sm:$0xff]  ;;  %v3206_v6 = vpack.c.bf16 %v423_v60, %v419_v59 }
  0x48   :  { %2081 = vmatmul.mubr.msk.f32.gmra.mrb[2].mxu0 %vm117_vm0, %v72_v47  ;;  %2226 = vmatprep.subr.bf16.mxu1 %v3179_v48  ;;  %v425_v7 = vld [vmem:[#allocation6 + $0xc0] sm:$0xff]  ;;  %v3210_v9 = vpack.c.bf16 %v430_v63, %v426_v62  ;;  %v427_v10 = vld [vmem:[#allocation6 + $0xd0] sm:$0xff]  ;;  %v3214_v12 = vpack.c.bf16 %v432_v5, %v428_v4  ;;  %v434_v13 = vld [vmem:[#allocation6 + $0x108] sm:$0xff] }
  0x49   :  { %2089 = vmatmul.mubr.msk.f32.gmra.mrb[2].mxu1 %vm117_vm0, %v72_v47  ;;  %2196 = vmatpush1.bf16.msra.mxu0 %v3183_v51  ;;  %v429_v8 = vld [vmem:[#allocation6 + $0xe0] sm:$0xff]  ;;  %v431_v11 = vld [vmem:[#allocation6 + $0xf0] sm:$0xff]  ;;  %v438_v14 = vld [vmem:[#allocation6 + $0x128] sm:$0xff] }
  0x4a   :  { %2228 = vmatpush1.bf16.msra.mxu1 %v3187_v55  ;;  %218 = vmatprep.mubr.f32.mxu0 %v3062_v0  ;;  %v74_v15 = vld [vmem:[%s3697_s0 + $0x18] sm:$0xff]  ;;  %v3221_v16 = vpack.c.bf16 %v429_v8, %v425_v7  ;;  %v3225_v19 = vpack.c.bf16 %v431_v11, %v427_v10  ;;  %v433_v20 = vld [vmem:[#allocation6 + $0x100] sm:$0xff]  ;;  %v3229_v22 = vpack.c.bf16 %v438_v14, %v434_v13  ;;  %v435_v23 = vld [vmem:[#allocation6 + $0x110] sm:$0xff] }
  0x4b   :  { %331 = vmatprep.mubr.f32.mxu1 %v3062_v0  ;;  %2198 = vmatprep.subr.bf16.mxu0 %v3191_v58  ;;  %v436_v17 = vld [vmem:[#allocation6 + $0x118] sm:$0xff]  ;;  %v437_v21 = vld [vmem:[#allocation6 + $0x120] sm:$0xff]  ;;  %v439_v24 = vld [vmem:[#allocation6 + $0x130] sm:$0xff] }
  0x4c   :  { %2082 = vmatmul.mubr.msk.f32.gmra.mrb[4].mxu0 %vm117_vm0, %v73_v2  ;;  %2230 = vmatprep.subr.bf16.mxu1 %v3195_v61  ;;  %v440_v18 = vld [vmem:[#allocation6 + $0x138] sm:$0xff]  ;;  %v442_v26 = vld [vmem:[#allocation6 + $0x148] sm:$0xff]  ;;  %v75_v28 = vld [vmem:[%s3697_s0 + $0x20] sm:$0xff]  ;;  %v3240_v29 = vpack.c.bf16 %v437_v21, %v433_v20  ;;  %v3244_v34 = vpack.c.bf16 %v439_v24, %v435_v23 }
  0x4d   :  { %2090 = vmatmul.mubr.msk.f32.gmra.mrb[4].mxu1 %vm117_vm0, %v73_v2  ;;  %2200 = vmatpush1.bf16.msra.mxu0 %v3202_v3  ;;  %v3233_v25 = vpack.c.bf16 %v440_v18, %v436_v17  ;;  %v446_v27 = vld [vmem:[#allocation6 + $0x168] sm:$0xff]  ;;  %v444_v32 = vld [vmem:[#allocation6 + $0x158] sm:$0xff]  ;;  %v441_v35 = vld [vmem:[#allocation6 + $0x140] sm:$0xff] }
  0x4e   :  { %2232 = vmatpush1.bf16.msra.mxu1 %v3206_v6  ;;  %224 = vmatprep.mubr.f32.mxu0 %v3062_v0  ;;  %v448_v33 = vld [vmem:[#allocation6 + $0x178] sm:$0xff]  ;;  %v445_v37 = vld [vmem:[#allocation6 + $0x160] sm:$0xff]  ;;  %v3248_v38 = vpack.c.bf16 %v446_v27, %v442_v26  ;;  %v443_v40 = vld [vmem:[#allocation6 + $0x150] sm:$0xff]  ;;  %v97_v27 = vlaneseq }
  0x4f   :  { %337 = vmatprep.mubr.f32.mxu1 %v3062_v0  ;;  %2202 = vmatprep.subr.bf16.mxu0 %v3210_v9  ;;  %v447_v41 = vld [vmem:[#allocation6 + $0x170] sm:$0xff]  ;;  %v3252_v42 = vpack.c.bf16 %v448_v33, %v444_v32  ;;  %v450_v44 = vld [vmem:[#allocation6 + $0x188] sm:$0xff]  ;;  %v3259_v47 = vpack.c.bf16 %v445_v37, %v441_v35  ;;  %v452_v49 = vld [vmem:[#allocation6 + $0x198] sm:$0xff] }
  0x50   :  { %2083 = vmatmul.mubr.msk.f32.gmra.mrb[6].mxu0 %vm117_vm0, %v74_v15  ;;  %2234 = vmatprep.subr.bf16.mxu1 %v3214_v12  ;;  %v454_v45 = vld [vmem:[#allocation6 + $0x1a8] sm:$0xff]  ;;  %v456_v50 = vld [vmem:[#allocation6 + $0x1b8] sm:$0xff]  ;;  %v3263_v52 = vpack.c.bf16 %v447_v41, %v443_v40  ;;  %v449_v53 = vld [vmem:[#allocation6 + $0x180] sm:$0xff] }
  0x51   :  { %2091 = vmatmul.mubr.msk.f32.gmra.mrb[6].mxu1 %vm117_vm0, %v74_v15  ;;  %2204 = vmatpush1.bf16.msra.mxu0 %v3221_v16  ;;  %v76_v46 = vld [vmem:[%s3697_s0 + $0x28] sm:$0xff]  ;;  %v453_v54 = vld [vmem:[#allocation6 + $0x1a0] sm:$0xff]  ;;  %v3267_v56 = vpack.c.bf16 %v454_v45, %v450_v44  ;;  %v451_v57 = vld [vmem:[#allocation6 + $0x190] sm:$0xff]  ;;  %v3271_v60 = vpack.c.bf16 %v456_v50, %v452_v49 }
  0x52   :  { %2236 = vmatpush1.bf16.msra.mxu1 %v3225_v19  ;;  %230 = vmatprep.mubr.f32.mxu0 %v3062_v0  ;;  %v455_v59 = vld [vmem:[#allocation6 + $0x1b0] sm:$0xff]  ;;  %v458_v62 = vld [vmem:[#allocation6 + $0x1c8] sm:$0xff]  ;;  %v3278_v4 = vpack.c.bf16 %v453_v54, %v449_v53  ;;  %v460_v5 = vld [vmem:[#allocation6 + $0x1d8] sm:$0xff] }
  0x53   :  { %343 = vmatprep.mubr.f32.mxu1 %v3062_v0  ;;  %2206 = vmatprep.subr.bf16.mxu0 %v3229_v22  ;;  %v462_v63 = vld [vmem:[#allocation6 + $0x1e8] sm:$0xff]  ;;  %v77_v2 = vld [vmem:[%s3697_s0 + $0x30] sm:$0xff]  ;;  %v464_v7 = vld [vmem:[#allocation6 + $0x1f8] sm:$0xff]  ;;  %v3282_v8 = vpack.c.bf16 %v455_v59, %v451_v57 }
  0x54   :  { %2084 = vmatmul.mubr.msk.f32.gmra.mrb[8].mxu0 %vm117_vm0, %v75_v28  ;;  %2238 = vmatprep.subr.bf16.mxu1 %v3233_v25  ;;  %v457_v10 = vld [vmem:[#allocation6 + $0x1c0] sm:$0xff]  ;;  %v3291_v14 = vpack.c.bf16 %v462_v63, %v458_v62  ;;  %v459_v15 = vld [vmem:[#allocation6 + $0x1d0] sm:$0xff]  ;;  %v3295_v18 = vpack.c.bf16 %v464_v7, %v460_v5  ;;  %v78_v20 = vld [vmem:[%s3697_s0 + $0x38] sm:$0xff] }
  0x55   :  { %2092 = vmatmul.mubr.msk.f32.gmra.mrb[8].mxu1 %vm117_vm0, %v75_v28  ;;  %2208 = vmatpush1.bf16.msra.mxu0 %v3240_v29  ;;  %v461_v11 = vld [vmem:[#allocation6 + $0x1e0] sm:$0xff]  ;;  %v463_v17 = vld [vmem:[#allocation6 + $0x1f0] sm:$0xff]  ;;  %v98_v28 = vshrl.u32 %v97_v27, 7 }
  0x56   :  { %2240 = vmatpush1.bf16.msra.mxu1 %v3244_v34  ;;  %236 = vmatprep.mubr.f32.mxu0 %v3062_v0  ;;  %v3287_v13 = vld [vmem:[%s3698_s1] sm:$0xff]  ;;  %v3302_v21 = vpack.c.bf16 %v461_v11, %v457_v10  ;;  %v3307_v23 = vpack.c.bf16 %v463_v17, %v459_v15 }
  0x57   :  { %349 = vmatprep.mubr.f32.mxu1 %v3062_v0  ;;  %2210 = vmatprep.subr.bf16.mxu0 %v3248_v38  ;;  %vm642_vm1 = vcmp.eq.s32.totalorder %v3287_v13, 1  ;;  %vm826_vm2 = vcmp.eq.s32.totalorder %v3287_v13, 2  ;;  %v99_v32 = vsub.s32 0, %v98_v28  ;;  %v95_v33 = vld [vmem:[%s3701_s4] sm:$0xf]  ;;  %v103_v35 = vsub.s32 1, %v98_v28 }
  0x58   :  { %2085 = vmatmul.mubr.msk.f32.gmra.mrb[10].mxu0 %vm117_vm0, %v76_v46  ;;  %2242 = vmatprep.subr.bf16.mxu1 %v3252_v42  ;;  %v643_v24 = vsel %vm642_vm1, 1, %v3063_v1  ;;  %v827_v26 = vsel %vm826_vm2, 1, %v3063_v1  ;;  %v111_v44 = vsub.s32 3, %v98_v28  ;;  %v107_v62 = vsub.s32 2, %v98_v28 }
  0x59   :  { %2093 = vmatmul.mubr.msk.f32.gmra.mrb[10].mxu1 %vm117_vm0, %v76_v46  ;;  %2212 = vmatpush1.bf16.msra.mxu0 %v3259_v47  ;;  %v3362_v37 = vrot.slane %v95_v33, %v99_v32  ;;  %v3364_v40 = vrot.slane %v95_v33, %v103_v35  ;;  %vm1010_vm3 = vcmp.eq.s32.totalorder %v3287_v13, 3  ;;  %vm1194_vm6 = vcmp.eq.s32.totalorder %v3287_v13, 4 }
  0x5a   :  { %2244 = vmatpush1.bf16.msra.mxu1 %v3263_v52  ;;  %242 = vmatprep.mubr.f32.mxu0 %v3062_v0  ;;  %v3368_v59 = vrot.slane %v95_v33, %v111_v44  ;;  %vm1378_vm8 = vcmp.eq.s32.totalorder %v3287_v13, 5  ;;  %vm1562_vm10 = vcmp.eq.s32.totalorder %v3287_v13, 6  ;;  %vm1746_vm12 = vcmp.eq.s32.totalorder %v3287_v13, 7 }
  0x5b   :  { %355 = vmatprep.mubr.f32.mxu1 %v3062_v0  ;;  %2214 = vmatprep.subr.bf16.mxu0 %v3267_v56 }
  0x5c   :  { %2086 = vmatmul.mubr.msk.f32.gmra.mrb[12].mxu0 %vm117_vm0, %v77_v2  ;;  %2246 = vmatprep.subr.bf16.mxu1 %v3271_v60 }
  0x5d   :  { %2094 = vmatmul.mubr.msk.f32.gmra.mrb[12].mxu1 %vm117_vm0, %v77_v2  ;;  %2216 = vmatpush1.bf16.msra.mxu0 %v3278_v4  ;;  %v3371_v2 = vrot.slane %v95_v33, %v107_v62 }
  0x5e   :  { %2248 = vmatpush1.bf16.msra.mxu1 %v3282_v8  ;;  %248 = vmatprep.mubr.f32.mxu0 %v3062_v0 }
  0x5f   :  { %361 = vmatprep.mubr.f32.mxu1 %v3062_v0  ;;  %2218 = vmatprep.subr.bf16.mxu0 %v3291_v14 }
  0x60   :  { %2087 = vmatmul.mubr.msk.f32.gmra.mrb[14].mxu0 %vm117_vm0, %v78_v20  ;;  %2250 = vmatprep.subr.bf16.mxu1 %v3295_v18 }
  0x61   :  { %2095 = vmatmul.mubr.msk.f32.gmra.mrb[14].mxu1 %vm117_vm0, %v78_v20  ;;  %2220 = vmatpush1.bf16.msra.mxu0 %v3302_v21  ;;  %vm3065_vm0 = vmmov 0  }
  0x62   :  { %2252 = vmatpush1.bf16.msra.mxu1 %v3307_v23  ;;  %536 = vmatprep.mubr.f32.mxu0 %v3062_v0 }
  0x63   :  { %607 = vmatprep.mubr.f32.mxu1 %v3062_v0  ;;  %645 = vperm.xlu0 %2802, %v643_v24  }
  0x64   :  { %537 = vmatmul.mubr.f32.vlgmr.msra.gmra.mrb[0].mxu0 %v3062_v0  ;;  %2254 = vmatprep.subr.bf16.mxu0 %v3160_v30 }
  0x65   :  { %608 = vmatmul.mubr.f32.vlgmr.msra.gmra.mrb[0].mxu1 %v3062_v0  ;;  %2286 = vmatprep.subr.bf16.mxu1 %v3162_v31 }
  0x66   :  { %2256 = vmatpush1.bf16.msra.mxu0 %v3167_v36  ;;  %2288 = vmatpush1.bf16.msra.mxu1 %v3170_v39 }
  0x67   :  { %2258 = vmatprep.subr.bf16.mxu0 %v3173_v43  ;;  %2290 = vmatprep.subr.bf16.mxu1 %v3179_v48 }
  0x68   :  { %720 = vmatprep.mubr.f32.mxu0 %v3062_v0  ;;  %791 = vmatprep.mubr.f32.mxu1 %v3062_v0 }
  0x69   :  { %829 = vperm.xlu0 %2802, %v827_v26  }
  0x6a   :  { %2260 = vmatpush1.bf16.msra.mxu0 %v3183_v51  ;;  %2292 = vmatpush1.bf16.msra.mxu1 %v3187_v55 }
  0x6b   :  { %2262 = vmatprep.subr.bf16.mxu0 %v3191_v58  ;;  %2294 = vmatprep.subr.bf16.mxu1 %v3195_v61 }
  0x6e   :  { %2264 = vmatpush1.bf16.msra.mxu0 %v3202_v3  ;;  %2296 = vmatpush1.bf16.msra.mxu1 %v3206_v6 }
  0x6f   :  { %2266 = vmatprep.subr.bf16.mxu0 %v3210_v9  ;;  %2298 = vmatprep.subr.bf16.mxu1 %v3214_v12 }
  0x72   :  { %2268 = vmatpush1.bf16.msra.mxu0 %v3221_v16  ;;  %2300 = vmatpush1.bf16.msra.mxu1 %v3225_v19 }
  0x73   :  { %2270 = vmatprep.subr.bf16.mxu0 %v3229_v22  ;;  %2302 = vmatprep.subr.bf16.mxu1 %v3233_v25 }
  0x76   :  { %2272 = vmatpush1.bf16.msra.mxu0 %v3240_v29  ;;  %2304 = vmatpush1.bf16.msra.mxu1 %v3244_v34 }
  0x77   :  { %2274 = vmatprep.subr.bf16.mxu0 %v3248_v38  ;;  %2306 = vmatprep.subr.bf16.mxu1 %v3252_v42 }
  0x7a   :  { %2276 = vmatpush1.bf16.msra.mxu0 %v3259_v47  ;;  %2308 = vmatpush1.bf16.msra.mxu1 %v3263_v52 }
  0x7b   :  { %2278 = vmatprep.subr.bf16.mxu0 %v3267_v56  ;;  %2310 = vmatprep.subr.bf16.mxu1 %v3271_v60 }
  0x7e   :  { %2280 = vmatpush1.bf16.msra.mxu0 %v3278_v4  ;;  %2312 = vmatpush1.bf16.msra.mxu1 %v3282_v8 }
  0x7f   :  { %2282 = vmatprep.subr.bf16.mxu0 %v3291_v14  ;;  %2314 = vmatprep.subr.bf16.mxu1 %v3295_v18 }
  0x82   :  { %2284 = vmatpush1.bf16.msra.mxu0 %v3302_v21  ;;  %2316 = vmatpush1.bf16.msra.mxu1 %v3307_v23 }
  0x83   :  { %2318 = vmatprep.subr.bf16.mxu0 %v3160_v30  ;;  %2350 = vmatprep.subr.bf16.mxu1 %v3162_v31 }
 0x137   :  { %v538_v41 = vpop.f32.mrb[0].mxu0 }
 0x138   :  { %v2725_v45 = vadd.f32 %v538_v41, %v3362_v37  ;;  %v609_v46 = vpop.f32.mrb[0].mxu1  ;;  %v540_v49 = vpop.f32.mrb[1].mxu0 }
 0x139   :  { %v2726_v50 = vadd.f32 %v540_v49, %v3364_v40  ;;  %v611_v53 = vpop.f32.mrb[1].mxu1  ;;  %v2741_v7 = vadd.f32 %v609_v46, %v3371_v2  ;;  %v1011_v46 = vsel %vm1010_vm3, 1, %v3063_v1 }
 0x13a   :  { %v2096_v54 = vmul.f32 -1.442695, %v2725_v45  ;;  %v2742_v63 = vadd.f32 %v611_v53, %v3368_v59  ;;  %1013 = vperm.xlu1 %2803, %v1011_v46  }
 0x13b   :  { %v2097_v57 = vmul.f32 -1.442695, %v2726_v50 }
 0x13c   :  { %2804 = vpow2.f32 %v2096_v54  ;;  %v2098_v5 = vmul.f32 -1.442695, %v2742_v63 }
 0x13d   :  { %2806 = vpow2.f32 %v2097_v57 }
 0x13e   :  { %2808 = vpow2.f32 %v2098_v5 }
 0x13f   :  { %2810 = vtanh.f32 %v2741_v7 }
 0x146   :  { %v2805_v10 = vpop.eup %2804 }
 0x147   :  { %v2807_v11 = vpop.eup %2806  ;;  %v621_v15 = vadd.f32 1.0, %v2805_v10 }
 0x148   :  { %v627_v17 = vadd.f32 1.0, %v2807_v11  ;;  %v2809_v20 = vpop.eup %2808 }
 0x149   :  { %2812 = vrcp.f32 %v621_v15  ;;  %v2811_v24 = vpop.eup %2810  ;;  %v634_v32 = vadd.f32 1.0, %v2809_v20 }
 0x14a   :  { %2814 = vrcp.f32 %v627_v17 }
 0x14b   :  { %2816 = vrcp.f32 %v634_v32 }
 0x153   :  { %v2813_v26 = vpop.eup %2812 }
 0x154   :  { %v2815_v27 = vpop.eup %2814  ;;  %v638_v28 = vmul.f32 %v2813_v26, %v2811_v24 }
 0x155   :  { %v637_v35 = vmul.f32 0.0, %v2815_v27  ;;  %v2817_v41 = vpop.eup %2816 }
 0x157   :  { %v3374_v33 = vadd.f32 %v638_v28, %v637_v35 }
 0x159   :  { %2818 = vtanh.f32 %v3374_v33 }
 0x163   :  { %v2819_v44 = vpop.eup %2818 }
 0x164   :  { %v3377_v45 = vmul.f32 %v2819_v44, %v2817_v41 }
 0x166   :  { %721 = vmatmul.mubr.f32.vlgmr.msra.gmra.mrb[2].mxu0 %v3377_v45  ;;  %792 = vmatmul.mubr.f32.vlgmr.msra.gmra.mrb[2].mxu1 %v3377_v45 }
 0x167   :  { %2320 = vmatpush1.bf16.msra.mxu0 %v3167_v36  ;;  %2352 = vmatpush1.bf16.msra.mxu1 %v3170_v39 }
 0x168   :  { %2322 = vmatprep.subr.bf16.mxu0 %v3173_v43  ;;  %2354 = vmatprep.subr.bf16.mxu1 %v3179_v48 }
 0x169   :  { %904 = vmatprep.mubr.f32.mxu0 %v3062_v0  ;;  %975 = vmatprep.mubr.f32.mxu1 %v3062_v0 }
 0x16b   :  { %2324 = vmatpush1.bf16.msra.mxu0 %v3183_v51  ;;  %2356 = vmatpush1.bf16.msra.mxu1 %v3187_v55 }
 0x16c   :  { %2326 = vmatprep.subr.bf16.mxu0 %v3191_v58  ;;  %2358 = vmatprep.subr.bf16.mxu1 %v3195_v61 }
 0x16f   :  { %2328 = vmatpush1.bf16.msra.mxu0 %v3202_v3  ;;  %2360 = vmatpush1.bf16.msra.mxu1 %v3206_v6 }
 0x170   :  { %2330 = vmatprep.subr.bf16.mxu0 %v3210_v9  ;;  %2362 = vmatprep.subr.bf16.mxu1 %v3214_v12 }
 0x173   :  { %2332 = vmatpush1.bf16.msra.mxu0 %v3221_v16  ;;  %2364 = vmatpush1.bf16.msra.mxu1 %v3225_v19 }
 0x174   :  { %2334 = vmatprep.subr.bf16.mxu0 %v3229_v22  ;;  %2366 = vmatprep.subr.bf16.mxu1 %v3233_v25 }
 0x177   :  { %2336 = vmatpush1.bf16.msra.mxu0 %v3240_v29  ;;  %2368 = vmatpush1.bf16.msra.mxu1 %v3244_v34 }
 0x178   :  { %2338 = vmatprep.subr.bf16.mxu0 %v3248_v38  ;;  %2370 = vmatprep.subr.bf16.mxu1 %v3252_v42 }
 0x17b   :  { %2340 = vmatpush1.bf16.msra.mxu0 %v3259_v47  ;;  %2372 = vmatpush1.bf16.msra.mxu1 %v3263_v52 }
 0x17c   :  { %2342 = vmatprep.subr.bf16.mxu0 %v3267_v56  ;;  %2374 = vmatprep.subr.bf16.mxu1 %v3271_v60 }
 0x17f   :  { %2344 = vmatpush1.bf16.msra.mxu0 %v3278_v4  ;;  %2376 = vmatpush1.bf16.msra.mxu1 %v3282_v8 }
 0x180   :  { %2346 = vmatprep.subr.bf16.mxu0 %v3291_v14  ;;  %2378 = vmatprep.subr.bf16.mxu1 %v3295_v18 }
 0x183   :  { %2348 = vmatpush1.bf16.msra.mxu0 %v3302_v21  ;;  %2380 = vmatpush1.bf16.msra.mxu1 %v3307_v23 }
 0x184   :  { %2382 = vmatprep.subr.bf16.mxu0 %v3160_v30  ;;  %2414 = vmatprep.subr.bf16.mxu1 %v3162_v31 }
 0x239   :  { %v722_v49 = vpop.f32.mrb[2].mxu0  ;;  %v793_v50 = vpop.f32.mrb[2].mxu1 }
 0x23a   :  { %v2727_v53 = vadd.f32 %v722_v49, %v3362_v37  ;;  %v724_v54 = vpop.f32.mrb[3].mxu0  ;;  %v795_v57 = vpop.f32.mrb[3].mxu1  ;;  %v2743_v11 = vadd.f32 %v793_v50, %v3371_v2 }
 0x23b   :  { %v2728_v62 = vadd.f32 %v724_v54, %v3364_v40  ;;  %v2744_v7 = vadd.f32 %v795_v57, %v3368_v59  ;;  %v646_v49 = vpop.permute.xlu0 %645 }
 0x23c   :  { %v2099_v63 = vmul.f32 -1.442695, %v2727_v53  ;;  %vm647_vm4 = vcmp.eq.s32.totalorder %v646_v49, 1 }
 0x23d   :  { %v2100_v5 = vmul.f32 -1.442695, %v2728_v62  ;;  %v2101_v10 = vmul.f32 -1.442695, %v2744_v7  ;;  %v648_v62 = vsel %vm647_vm4, %v3377_v45, 0.0 }
 0x23e   :  { %2820 = vpow2.f32 %v2099_v63 }
 0x23f   :  { %2822 = vpow2.f32 %v2100_v5  ;;  %v830_v50 = vpop.permute.xlu0 %829 }
 0x240   :  { %2824 = vpow2.f32 %v2101_v10  ;;  %vm831_vm5 = vcmp.eq.s32.totalorder %v830_v50, 1 }
 0x241   :  { %2826 = vtanh.f32 %v2743_v11 }
 0x248   :  { %v2821_v15 = vpop.eup %2820 }
 0x249   :  { %v2823_v17 = vpop.eup %2822  ;;  %v805_v20 = vadd.f32 1.0, %v2821_v15 }
 0x24a   :  { %v811_v24 = vadd.f32 1.0, %v2823_v17  ;;  %v2825_v26 = vpop.eup %2824 }
 0x24b   :  { %2828 = vrcp.f32 %v805_v20  ;;  %v2827_v27 = vpop.eup %2826  ;;  %v818_v41 = vadd.f32 1.0, %v2825_v26 }
 0x24c   :  { %2830 = vrcp.f32 %v811_v24 }
 0x24d   :  { %2832 = vrcp.f32 %v818_v41 }
 0x255   :  { %v2829_v28 = vpop.eup %2828 }
 0x256   :  { %v2831_v32 = vpop.eup %2830  ;;  %v822_v35 = vmul.f32 %v2829_v28, %v2827_v27 }
 0x257   :  { %v821_v44 = vmul.f32 %v2831_v32, %v3374_v33  ;;  %v2833_v53 = vpop.eup %2832  ;;  %v1195_v33 = vsel %vm1194_vm6, 1, %v3063_v1 }
 0x258   :  { %1197 = vperm.xlu1 %2803, %v1195_v33  }
 0x259   :  { %v3422_v46 = vadd.f32 %v822_v35, %v821_v44 }
 0x25b   :  { %2834 = vtanh.f32 %v3422_v46 }
 0x265   :  { %v2835_v54 = vpop.eup %2834 }
 0x266   :  { %v825_v57 = vmul.f32 %v2835_v54, %v2833_v53 }
 0x268   :  { %v3426_v63 = vsel %vm831_vm5, %v825_v57, %v648_v62  ;;  %905 = vmatmul.mubr.f32.vlgmr.msra.gmra.mrb[4].mxu0 %v825_v57  ;;  %976 = vmatmul.mubr.f32.vlgmr.msra.gmra.mrb[4].mxu1 %v825_v57 }
 0x269   :  { %2384 = vmatpush1.bf16.msra.mxu0 %v3167_v36  ;;  %2416 = vmatpush1.bf16.msra.mxu1 %v3170_v39 }
 0x26a   :  { %2386 = vmatprep.subr.bf16.mxu0 %v3173_v43  ;;  %2418 = vmatprep.subr.bf16.mxu1 %v3179_v48 }
 0x26b   :  { %1088 = vmatprep.mubr.f32.mxu0 %v3062_v0  ;;  %1159 = vmatprep.mubr.f32.mxu1 %v3062_v0 }
 0x26d   :  { %2388 = vmatpush1.bf16.msra.mxu0 %v3183_v51  ;;  %2420 = vmatpush1.bf16.msra.mxu1 %v3187_v55 }
 0x26e   :  { %2390 = vmatprep.subr.bf16.mxu0 %v3191_v58  ;;  %2422 = vmatprep.subr.bf16.mxu1 %v3195_v61 }
 0x271   :  { %2392 = vmatpush1.bf16.msra.mxu0 %v3202_v3  ;;  %2424 = vmatpush1.bf16.msra.mxu1 %v3206_v6 }
 0x272   :  { %2394 = vmatprep.subr.bf16.mxu0 %v3210_v9  ;;  %2426 = vmatprep.subr.bf16.mxu1 %v3214_v12 }
 0x275   :  { %2396 = vmatpush1.bf16.msra.mxu0 %v3221_v16  ;;  %2428 = vmatpush1.bf16.msra.mxu1 %v3225_v19 }
 0x276   :  { %2398 = vmatprep.subr.bf16.mxu0 %v3229_v22  ;;  %2430 = vmatprep.subr.bf16.mxu1 %v3233_v25 }
 0x279   :  { %2400 = vmatpush1.bf16.msra.mxu0 %v3240_v29  ;;  %2432 = vmatpush1.bf16.msra.mxu1 %v3244_v34 }
 0x27a   :  { %2402 = vmatprep.subr.bf16.mxu0 %v3248_v38  ;;  %2434 = vmatprep.subr.bf16.mxu1 %v3252_v42 }
 0x27d   :  { %2404 = vmatpush1.bf16.msra.mxu0 %v3259_v47  ;;  %2436 = vmatpush1.bf16.msra.mxu1 %v3263_v52 }
 0x27e   :  { %2406 = vmatprep.subr.bf16.mxu0 %v3267_v56  ;;  %2438 = vmatprep.subr.bf16.mxu1 %v3271_v60 }
 0x281   :  { %2408 = vmatpush1.bf16.msra.mxu0 %v3278_v4  ;;  %2440 = vmatpush1.bf16.msra.mxu1 %v3282_v8 }
 0x282   :  { %2410 = vmatprep.subr.bf16.mxu0 %v3291_v14  ;;  %2442 = vmatprep.subr.bf16.mxu1 %v3295_v18 }
 0x285   :  { %2412 = vmatpush1.bf16.msra.mxu0 %v3302_v21  ;;  %2444 = vmatpush1.bf16.msra.mxu1 %v3307_v23 }
 0x286   :  { %2446 = vmatprep.subr.bf16.mxu0 %v3160_v30  ;;  %2478 = vmatprep.subr.bf16.mxu1 %v3162_v31 }
 0x33b   :  { %v906_v45 = vpop.f32.mrb[4].mxu0  ;;  %v977_v5 = vpop.f32.mrb[4].mxu1 }
 0x33c   :  { %v2729_v7 = vadd.f32 %v906_v45, %v3362_v37  ;;  %v908_v10 = vpop.f32.mrb[5].mxu0  ;;  %v979_v11 = vpop.f32.mrb[5].mxu1  ;;  %v2745_v27 = vadd.f32 %v977_v5, %v3371_v2 }
 0x33d   :  { %v2730_v15 = vadd.f32 %v908_v10, %v3364_v40  ;;  %v2746_v24 = vadd.f32 %v979_v11, %v3368_v59  ;;  %v1014_v45 = vpop.permute.xlu1 %1013 }
 0x33e   :  { %v2102_v17 = vmul.f32 -1.442695, %v2729_v7  ;;  %vm1015_vm7 = vcmp.eq.s32.totalorder %v1014_v45, 1 }
 0x33f   :  { %v2103_v20 = vmul.f32 -1.442695, %v2730_v15  ;;  %v2104_v26 = vmul.f32 -1.442695, %v2746_v24 }
 0x340   :  { %2836 = vpow2.f32 %v2102_v17 }
 0x341   :  { %2838 = vpow2.f32 %v2103_v20 }
 0x342   :  { %2840 = vpow2.f32 %v2104_v26 }
 0x343   :  { %2842 = vtanh.f32 %v2745_v27 }
 0x34a   :  { %v2837_v28 = vpop.eup %2836 }
 0x34b   :  { %v2839_v32 = vpop.eup %2838  ;;  %v989_v35 = vadd.f32 1.0, %v2837_v28 }
 0x34c   :  { %v995_v41 = vadd.f32 1.0, %v2839_v32  ;;  %v2841_v44 = vpop.eup %2840 }
 0x34d   :  { %2844 = vrcp.f32 %v989_v35  ;;  %v2843_v49 = vpop.eup %2842  ;;  %v1002_v57 = vadd.f32 1.0, %v2841_v44 }
 0x34e   :  { %2846 = vrcp.f32 %v995_v41 }
 0x34f   :  { %2848 = vrcp.f32 %v1002_v57 }
 0x357   :  { %v2845_v50 = vpop.eup %2844 }
 0x358   :  { %v2847_v53 = vpop.eup %2846  ;;  %v1006_v54 = vmul.f32 %v2845_v50, %v2843_v49 }
 0x359   :  { %v1005_v62 = vmul.f32 %v2847_v53, %v3422_v46  ;;  %v2849_v5 = vpop.eup %2848  ;;  %v1379_v46 = vsel %vm1378_vm8, 1, %v3063_v1 }
 0x35a   :  { %1381 = vperm.xlu0 %2802, %v1379_v46  }
 0x35b   :  { %v3469_v33 = vadd.f32 %v1006_v54, %v1005_v62 }
 0x35d   :  { %2850 = vtanh.f32 %v3469_v33 }
 0x367   :  { %v2851_v7 = vpop.eup %2850 }
 0x368   :  { %v1009_v10 = vmul.f32 %v2851_v7, %v2849_v5 }
 0x36a   :  { %v3473_v11 = vsel %vm1015_vm7, %v1009_v10, %v3426_v63  ;;  %1089 = vmatmul.mubr.f32.vlgmr.msra.gmra.mrb[6].mxu0 %v1009_v10  ;;  %1160 = vmatmul.mubr.f32.vlgmr.msra.gmra.mrb[6].mxu1 %v1009_v10 }
 0x36b   :  { %2448 = vmatpush1.bf16.msra.mxu0 %v3167_v36  ;;  %2480 = vmatpush1.bf16.msra.mxu1 %v3170_v39 }
 0x36c   :  { %2450 = vmatprep.subr.bf16.mxu0 %v3173_v43  ;;  %2482 = vmatprep.subr.bf16.mxu1 %v3179_v48 }
 0x36d   :  { %1272 = vmatprep.mubr.f32.mxu0 %v3062_v0  ;;  %1343 = vmatprep.mubr.f32.mxu1 %v3062_v0 }
 0x36f   :  { %2452 = vmatpush1.bf16.msra.mxu0 %v3183_v51  ;;  %2484 = vmatpush1.bf16.msra.mxu1 %v3187_v55 }
 0x370   :  { %2454 = vmatprep.subr.bf16.mxu0 %v3191_v58  ;;  %2486 = vmatprep.subr.bf16.mxu1 %v3195_v61 }
 0x373   :  { %2456 = vmatpush1.bf16.msra.mxu0 %v3202_v3  ;;  %2488 = vmatpush1.bf16.msra.mxu1 %v3206_v6 }
 0x374   :  { %2458 = vmatprep.subr.bf16.mxu0 %v3210_v9  ;;  %2490 = vmatprep.subr.bf16.mxu1 %v3214_v12 }
 0x377   :  { %2460 = vmatpush1.bf16.msra.mxu0 %v3221_v16  ;;  %2492 = vmatpush1.bf16.msra.mxu1 %v3225_v19 }
 0x378   :  { %2462 = vmatprep.subr.bf16.mxu0 %v3229_v22  ;;  %2494 = vmatprep.subr.bf16.mxu1 %v3233_v25 }
 0x37b   :  { %2464 = vmatpush1.bf16.msra.mxu0 %v3240_v29  ;;  %2496 = vmatpush1.bf16.msra.mxu1 %v3244_v34 }
 0x37c   :  { %2466 = vmatprep.subr.bf16.mxu0 %v3248_v38  ;;  %2498 = vmatprep.subr.bf16.mxu1 %v3252_v42 }
 0x37f   :  { %2468 = vmatpush1.bf16.msra.mxu0 %v3259_v47  ;;  %2500 = vmatpush1.bf16.msra.mxu1 %v3263_v52 }
 0x380   :  { %2470 = vmatprep.subr.bf16.mxu0 %v3267_v56  ;;  %2502 = vmatprep.subr.bf16.mxu1 %v3271_v60 }
 0x383   :  { %2472 = vmatpush1.bf16.msra.mxu0 %v3278_v4  ;;  %2504 = vmatpush1.bf16.msra.mxu1 %v3282_v8 }
 0x384   :  { %2474 = vmatprep.subr.bf16.mxu0 %v3291_v14  ;;  %2506 = vmatprep.subr.bf16.mxu1 %v3295_v18 }
 0x387   :  { %2476 = vmatpush1.bf16.msra.mxu0 %v3302_v21  ;;  %2508 = vmatpush1.bf16.msra.mxu1 %v3307_v23 }
 0x388   :  { %2510 = vmatprep.subr.bf16.mxu0 %v3160_v30  ;;  %2542 = vmatprep.subr.bf16.mxu1 %v3162_v31 }
 0x43d   :  { %v1090_v63 = vpop.f32.mrb[6].mxu0  ;;  %v1161_v15 = vpop.f32.mrb[6].mxu1 }
 0x43e   :  { %v2731_v17 = vadd.f32 %v1090_v63, %v3362_v37  ;;  %v1092_v20 = vpop.f32.mrb[7].mxu0  ;;  %v1163_v24 = vpop.f32.mrb[7].mxu1  ;;  %v2747_v41 = vadd.f32 %v1161_v15, %v3371_v2 }
 0x43f   :  { %v2732_v26 = vadd.f32 %v1092_v20, %v3364_v40  ;;  %v2748_v32 = vadd.f32 %v1163_v24, %v3368_v59  ;;  %v1198_v63 = vpop.permute.xlu1 %1197 }
 0x440   :  { %v2105_v27 = vmul.f32 -1.442695, %v2731_v17  ;;  %vm1199_vm9 = vcmp.eq.s32.totalorder %v1198_v63, 1 }
 0x441   :  { %v2106_v28 = vmul.f32 -1.442695, %v2732_v26  ;;  %v2107_v35 = vmul.f32 -1.442695, %v2748_v32 }
 0x442   :  { %2852 = vpow2.f32 %v2105_v27 }
 0x443   :  { %2854 = vpow2.f32 %v2106_v28 }
 0x444   :  { %2856 = vpow2.f32 %v2107_v35 }
 0x445   :  { %2858 = vtanh.f32 %v2747_v41 }
 0x44c   :  { %v2853_v44 = vpop.eup %2852 }
 0x44d   :  { %v2855_v49 = vpop.eup %2854  ;;  %v1173_v50 = vadd.f32 1.0, %v2853_v44 }
 0x44e   :  { %v1179_v53 = vadd.f32 1.0, %v2855_v49  ;;  %v2857_v54 = vpop.eup %2856 }
 0x44f   :  { %2860 = vrcp.f32 %v1173_v50  ;;  %v2859_v57 = vpop.eup %2858  ;;  %v1186_v7 = vadd.f32 1.0, %v2857_v54 }
 0x450   :  { %2862 = vrcp.f32 %v1179_v53 }
 0x451   :  { %2864 = vrcp.f32 %v1186_v7 }
 0x459   :  { %v2861_v62 = vpop.eup %2860 }
 0x45a   :  { %v2863_v45 = vpop.eup %2862  ;;  %v1190_v5 = vmul.f32 %v2861_v62, %v2859_v57 }
 0x45b   :  { %v1189_v10 = vmul.f32 %v2863_v45, %v3469_v33  ;;  %v2865_v15 = vpop.eup %2864  ;;  %v1563_v33 = vsel %vm1562_vm10, 1, %v3063_v1 }
 0x45c   :  { %1565 = vperm.xlu1 %2803, %v1563_v33  }
 0x45d   :  { %v3516_v46 = vadd.f32 %v1190_v5, %v1189_v10 }
 0x45f   :  { %2866 = vtanh.f32 %v3516_v46 }
 0x469   :  { %v2867_v17 = vpop.eup %2866 }
 0x46a   :  { %v1193_v20 = vmul.f32 %v2867_v17, %v2865_v15 }
 0x46c   :  { %v3520_v24 = vsel %vm1199_vm9, %v1193_v20, %v3473_v11  ;;  %1273 = vmatmul.mubr.f32.vlgmr.msra.gmra.mrb[8].mxu0 %v1193_v20  ;;  %1344 = vmatmul.mubr.f32.vlgmr.msra.gmra.mrb[8].mxu1 %v1193_v20 }
 0x46d   :  { %2512 = vmatpush1.bf16.msra.mxu0 %v3167_v36  ;;  %2544 = vmatpush1.bf16.msra.mxu1 %v3170_v39 }
 0x46e   :  { %2514 = vmatprep.subr.bf16.mxu0 %v3173_v43  ;;  %2546 = vmatprep.subr.bf16.mxu1 %v3179_v48 }
 0x46f   :  { %1456 = vmatprep.mubr.f32.mxu0 %v3062_v0  ;;  %1527 = vmatprep.mubr.f32.mxu1 %v3062_v0 }
 0x471   :  { %2516 = vmatpush1.bf16.msra.mxu0 %v3183_v51  ;;  %2548 = vmatpush1.bf16.msra.mxu1 %v3187_v55 }
 0x472   :  { %2518 = vmatprep.subr.bf16.mxu0 %v3191_v58  ;;  %2550 = vmatprep.subr.bf16.mxu1 %v3195_v61 }
 0x475   :  { %2520 = vmatpush1.bf16.msra.mxu0 %v3202_v3  ;;  %2552 = vmatpush1.bf16.msra.mxu1 %v3206_v6 }
 0x476   :  { %2522 = vmatprep.subr.bf16.mxu0 %v3210_v9  ;;  %2554 = vmatprep.subr.bf16.mxu1 %v3214_v12 }
 0x479   :  { %2524 = vmatpush1.bf16.msra.mxu0 %v3221_v16  ;;  %2556 = vmatpush1.bf16.msra.mxu1 %v3225_v19 }
 0x47a   :  { %2526 = vmatprep.subr.bf16.mxu0 %v3229_v22  ;;  %2558 = vmatprep.subr.bf16.mxu1 %v3233_v25 }
 0x47d   :  { %2528 = vmatpush1.bf16.msra.mxu0 %v3240_v29  ;;  %2560 = vmatpush1.bf16.msra.mxu1 %v3244_v34 }
 0x47e   :  { %2530 = vmatprep.subr.bf16.mxu0 %v3248_v38  ;;  %2562 = vmatprep.subr.bf16.mxu1 %v3252_v42 }
 0x481   :  { %2532 = vmatpush1.bf16.msra.mxu0 %v3259_v47  ;;  %2564 = vmatpush1.bf16.msra.mxu1 %v3263_v52 }
 0x482   :  { %2534 = vmatprep.subr.bf16.mxu0 %v3267_v56  ;;  %2566 = vmatprep.subr.bf16.mxu1 %v3271_v60 }
 0x485   :  { %2536 = vmatpush1.bf16.msra.mxu0 %v3278_v4  ;;  %2568 = vmatpush1.bf16.msra.mxu1 %v3282_v8 }
 0x486   :  { %2538 = vmatprep.subr.bf16.mxu0 %v3291_v14  ;;  %2570 = vmatprep.subr.bf16.mxu1 %v3295_v18 }
 0x489   :  { %2540 = vmatpush1.bf16.msra.mxu0 %v3302_v21  ;;  %2572 = vmatpush1.bf16.msra.mxu1 %v3307_v23 }
 0x48a   :  { %2574 = vmatprep.subr.bf16.mxu0 %v3160_v30  ;;  %2606 = vmatprep.subr.bf16.mxu1 %v3162_v31 }
 0x53f   :  { %v1274_v11 = vpop.f32.mrb[8].mxu0  ;;  %v1345_v26 = vpop.f32.mrb[8].mxu1 }
 0x540   :  { %v2733_v27 = vadd.f32 %v1274_v11, %v3362_v37  ;;  %v1276_v28 = vpop.f32.mrb[9].mxu0  ;;  %v1347_v32 = vpop.f32.mrb[9].mxu1  ;;  %v2749_v53 = vadd.f32 %v1345_v26, %v3371_v2 }
 0x541   :  { %v2734_v35 = vadd.f32 %v1276_v28, %v3364_v40  ;;  %v2750_v49 = vadd.f32 %v1347_v32, %v3368_v59  ;;  %v1382_v11 = vpop.permute.xlu0 %1381 }
 0x542   :  { %v2108_v41 = vmul.f32 -1.442695, %v2733_v27  ;;  %vm1383_vm11 = vcmp.eq.s32.totalorder %v1382_v11, 1 }
 0x543   :  { %v2109_v44 = vmul.f32 -1.442695, %v2734_v35  ;;  %v2110_v50 = vmul.f32 -1.442695, %v2750_v49 }
 0x544   :  { %2868 = vpow2.f32 %v2108_v41 }
 0x545   :  { %2870 = vpow2.f32 %v2109_v44 }
 0x546   :  { %2872 = vpow2.f32 %v2110_v50 }
 0x547   :  { %2874 = vtanh.f32 %v2749_v53 }
 0x54e   :  { %v2869_v54 = vpop.eup %2868 }
 0x54f   :  { %v2871_v57 = vpop.eup %2870  ;;  %v1357_v62 = vadd.f32 1.0, %v2869_v54 }
 0x550   :  { %v1363_v45 = vadd.f32 1.0, %v2871_v57  ;;  %v2873_v5 = vpop.eup %2872 }
 0x551   :  { %2876 = vrcp.f32 %v1357_v62  ;;  %v2875_v7 = vpop.eup %2874  ;;  %v1370_v17 = vadd.f32 1.0, %v2873_v5 }
 0x552   :  { %2878 = vrcp.f32 %v1363_v45 }
 0x553   :  { %2880 = vrcp.f32 %v1370_v17 }
 0x55b   :  { %v2877_v10 = vpop.eup %2876 }
 0x55c   :  { %v2879_v63 = vpop.eup %2878  ;;  %v1374_v15 = vmul.f32 %v2877_v10, %v2875_v7 }
 0x55d   :  { %v1373_v20 = vmul.f32 %v2879_v63, %v3516_v46  ;;  %v2881_v26 = vpop.eup %2880  ;;  %v1747_v46 = vsel %vm1746_vm12, 1, %v3063_v1 }
 0x55e   :  { %1749 = vperm.xlu0 %2802, %v1747_v46  }
 0x55f   :  { %v3563_v33 = vadd.f32 %v1374_v15, %v1373_v20 }
 0x561   :  { %2882 = vtanh.f32 %v3563_v33 }
 0x56b   :  { %v2883_v27 = vpop.eup %2882 }
 0x56c   :  { %v1377_v28 = vmul.f32 %v2883_v27, %v2881_v26  ;;  %v1566_v27 = vpop.permute.xlu1 %1565 }
 0x56d   :  { %vm1567_vm13 = vcmp.eq.s32.totalorder %v1566_v27, 1 }
 0x56e   :  { %v3567_v32 = vsel %vm1383_vm11, %v1377_v28, %v3520_v24  ;;  %1457 = vmatmul.mubr.f32.vlgmr.msra.gmra.mrb[10].mxu0 %v1377_v28  ;;  %1528 = vmatmul.mubr.f32.vlgmr.msra.gmra.mrb[10].mxu1 %v1377_v28 }
 0x56f   :  { %2576 = vmatpush1.bf16.msra.mxu0 %v3167_v36  ;;  %2608 = vmatpush1.bf16.msra.mxu1 %v3170_v39 }
 0x570   :  { %2578 = vmatprep.subr.bf16.mxu0 %v3173_v43  ;;  %2610 = vmatprep.subr.bf16.mxu1 %v3179_v48 }
 0x571   :  { %1640 = vmatprep.mubr.f32.mxu0 %v3062_v0  ;;  %1711 = vmatprep.mubr.f32.mxu1 %v3062_v0 }
 0x573   :  { %2580 = vmatpush1.bf16.msra.mxu0 %v3183_v51  ;;  %2612 = vmatpush1.bf16.msra.mxu1 %v3187_v55 }
 0x574   :  { %2582 = vmatprep.subr.bf16.mxu0 %v3191_v58  ;;  %2614 = vmatprep.subr.bf16.mxu1 %v3195_v61 }
 0x577   :  { %2584 = vmatpush1.bf16.msra.mxu0 %v3202_v3  ;;  %2616 = vmatpush1.bf16.msra.mxu1 %v3206_v6 }
 0x578   :  { %2586 = vmatprep.subr.bf16.mxu0 %v3210_v9  ;;  %2618 = vmatprep.subr.bf16.mxu1 %v3214_v12 }
 0x57b   :  { %2588 = vmatpush1.bf16.msra.mxu0 %v3221_v16  ;;  %2620 = vmatpush1.bf16.msra.mxu1 %v3225_v19 }
 0x57c   :  { %2590 = vmatprep.subr.bf16.mxu0 %v3229_v22  ;;  %2622 = vmatprep.subr.bf16.mxu1 %v3233_v25 }
 0x57f   :  { %2592 = vmatpush1.bf16.msra.mxu0 %v3240_v29  ;;  %2624 = vmatpush1.bf16.msra.mxu1 %v3244_v34 }
 0x580   :  { %2594 = vmatprep.subr.bf16.mxu0 %v3248_v38  ;;  %2626 = vmatprep.subr.bf16.mxu1 %v3252_v42 }
 0x583   :  { %2596 = vmatpush1.bf16.msra.mxu0 %v3259_v47  ;;  %2628 = vmatpush1.bf16.msra.mxu1 %v3263_v52 }
 0x584   :  { %2598 = vmatprep.subr.bf16.mxu0 %v3267_v56  ;;  %2630 = vmatprep.subr.bf16.mxu1 %v3271_v60 }
 0x587   :  { %2600 = vmatpush1.bf16.msra.mxu0 %v3278_v4  ;;  %2632 = vmatpush1.bf16.msra.mxu1 %v3282_v8 }
 0x588   :  { %2602 = vmatprep.subr.bf16.mxu0 %v3291_v14  ;;  %2634 = vmatprep.subr.bf16.mxu1 %v3295_v18 }
 0x58b   :  { %2604 = vmatpush1.bf16.msra.mxu0 %v3302_v21  ;;  %2636 = vmatpush1.bf16.msra.mxu1 %v3307_v23 }
 0x58c   :  { %2638 = vmatprep.subr.bf16.mxu0 %v3160_v30  ;;  %2670 = vmatprep.subr.bf16.mxu1 %v3162_v31 }
 0x641   :  { %v1458_v24 = vpop.f32.mrb[10].mxu0  ;;  %v1529_v35 = vpop.f32.mrb[10].mxu1 }
 0x642   :  { %v2735_v41 = vadd.f32 %v1458_v24, %v3362_v37  ;;  %v1460_v44 = vpop.f32.mrb[11].mxu0  ;;  %v1531_v49 = vpop.f32.mrb[11].mxu1  ;;  %v2751_v13 = vadd.f32 %v1529_v35, %v3371_v2 }
 0x643   :  { %v2736_v50 = vadd.f32 %v1460_v44, %v3364_v40  ;;  %v2752_v30 = vadd.f32 %v1531_v49, %v3368_v59  ;;  %v1940_v44 = vld [vmem:[#allocation8 + $0x10] sm:$0xff]  ;;  %v1941_v49 = vld [vmem:[#allocation8 + $0x18] sm:$0xff] }
 0x644   :  { %v2111_v53 = vmul.f32 -1.442695, %v2735_v41  ;;  %v3064_v41 = vmov 0.0|0.0  }
 0x645   :  { %v2112_v54 = vmul.f32 -1.442695, %v2736_v50  ;;  %v2113_v31 = vmul.f32 -1.442695, %v2752_v30  ;;  %v2705_v50 = vpack.c.bf16 %v1941_v49, %v1940_v44 }
 0x646   :  { %2884 = vpow2.f32 %v2111_v53  ;;  %v1942_v53 = vld [vmem:[#allocation8 + $0x20] sm:$0xff] }
 0x647   :  { %2886 = vpow2.f32 %v2112_v54  ;;  %v1943_v54 = vld [vmem:[#allocation8 + $0x28] sm:$0xff] }
 0x648   :  { %2888 = vpow2.f32 %v2113_v31  ;;  %v2708_v30 = vpack.c.bf16 %v1943_v54, %v1942_v53  ;;  %v1944_v31 = vld [vmem:[#allocation8 + $0x30] sm:$0xff] }
 0x649   :  { %2890 = vtanh.f32 %v2751_v13  ;;  %v1945_v13 = vld [vmem:[#allocation8 + $0x38] sm:$0xff] }
 0x650   :  { %v2885_v57 = vpop.eup %2884 }
 0x651   :  { %v2887_v62 = vpop.eup %2886  ;;  %v1541_v45 = vadd.f32 1.0, %v2885_v57  ;;  %v2711_v57 = vpack.c.bf16 %v1945_v13, %v1944_v31 }
 0x652   :  { %v1547_v5 = vadd.f32 1.0, %v2887_v62  ;;  %v2889_v7 = vpop.eup %2888  ;;  %v1946_v62 = vld [vmem:[#allocation8 + $0x40] sm:$0xff] }
 0x653   :  { %2892 = vrcp.f32 %v1541_v45  ;;  %v2891_v10 = vpop.eup %2890  ;;  %v1554_v20 = vadd.f32 1.0, %v2889_v7  ;;  %v1947_v45 = vld [vmem:[#allocation8 + $0x48] sm:$0xff]  ;;  %v1948_v7 = vld [vmem:[#allocation8 + $0x50] sm:$0xff] }
 0x654   :  { %2894 = vrcp.f32 %v1547_v5  ;;  %v2714_v5 = vpack.c.bf16 %v1947_v45, %v1946_v62 }
 0x655   :  { %2896 = vrcp.f32 %v1554_v20 }
 0x65d   :  { %v2893_v63 = vpop.eup %2892 }
 0x65e   :  { %v2895_v15 = vpop.eup %2894  ;;  %v1558_v17 = vmul.f32 %v2893_v63, %v2891_v10  ;;  %v1949_v10 = vld [vmem:[#allocation8 + $0x58] sm:$0xff] }
 0x65f   :  { %v1557_v11 = vmul.f32 %v2895_v15, %v3563_v33  ;;  %v2897_v28 = vpop.eup %2896  ;;  %v1939_v33 = vld [vmem:[#allocation8 + $0x8] sm:$0xff]  ;;  %v2717_v63 = vpack.c.bf16 %v1949_v10, %v1948_v7  ;;  %v1950_v15 = vld [vmem:[#allocation8 + $0x60] sm:$0xff] }
 0x661   :  { %v3610_v26 = vadd.f32 %v1558_v17, %v1557_v11  ;;  %v1951_v17 = vld [vmem:[#allocation8 + $0x68] sm:$0xff]  ;;  %v1952_v11 = vld [vmem:[#allocation8 + $0x70] sm:$0xff] }
 0x662   :  { %v2720_v20 = vpack.c.bf16 %v1951_v17, %v1950_v15 }
 0x663   :  { %2898 = vtanh.f32 %v3610_v26 }
 0x66d   :  { %v2899_v46 = vpop.eup %2898 }
 0x66e   :  { %v1561_v24 = vmul.f32 %v2899_v46, %v2897_v28 }
 0x670   :  { %v3614_v35 = vsel %vm1567_vm13, %v1561_v24, %v3567_v32  ;;  %1641 = vmatmul.mubr.f32.vlgmr.msra.gmra.mrb[12].mxu0 %v1561_v24  ;;  %1712 = vmatmul.mubr.f32.vlgmr.msra.gmra.mrb[12].mxu1 %v1561_v24 }
 0x671   :  { %2640 = vmatpush1.bf16.msra.mxu0 %v3167_v36  ;;  %2672 = vmatpush1.bf16.msra.mxu1 %v3170_v39  ;;  %v2936_v36 = vld [vmem:[%s3698_s1] sm:$0xff] }
 0x672   :  { %2642 = vmatprep.subr.bf16.mxu0 %v3173_v43  ;;  %2674 = vmatprep.subr.bf16.mxu1 %v3179_v48  ;;  %vm1930_vm14 = vcmp.eq.s32.totalorder %v2936_v36, 8 }
 0x673   :  { %1824 = vmatprep.mubr.f32.mxu0 %v3062_v0  ;;  %1895 = vmatprep.mubr.f32.mxu1 %v3062_v0  ;;  %v1931_v39 = vsel %vm1930_vm14, 1, %v3063_v1 }
 0x674   :  { %1933 = vperm.xlu1 %2803, %v1931_v39  }
 0x675   :  { %2644 = vmatpush1.bf16.msra.mxu0 %v3183_v51  ;;  %2676 = vmatpush1.bf16.msra.mxu1 %v3187_v55 }
 0x676   :  { %2646 = vmatprep.subr.bf16.mxu0 %v3191_v58  ;;  %2678 = vmatprep.subr.bf16.mxu1 %v3195_v61 }
 0x679   :  { %2648 = vmatpush1.bf16.msra.mxu0 %v3202_v3  ;;  %2680 = vmatpush1.bf16.msra.mxu1 %v3206_v6 }
 0x67a   :  { %2650 = vmatprep.subr.bf16.mxu0 %v3210_v9  ;;  %2682 = vmatprep.subr.bf16.mxu1 %v3214_v12 }
 0x67d   :  { %2652 = vmatpush1.bf16.msra.mxu0 %v3221_v16  ;;  %2684 = vmatpush1.bf16.msra.mxu1 %v3225_v19 }
 0x67e   :  { %2654 = vmatprep.subr.bf16.mxu0 %v3229_v22  ;;  %2686 = vmatprep.subr.bf16.mxu1 %v3233_v25 }
 0x681   :  { %2656 = vmatpush1.bf16.msra.mxu0 %v3240_v29  ;;  %2688 = vmatpush1.bf16.msra.mxu1 %v3244_v34 }
 0x682   :  { %2658 = vmatprep.subr.bf16.mxu0 %v3248_v38  ;;  %2690 = vmatprep.subr.bf16.mxu1 %v3252_v42 }
 0x685   :  { %2660 = vmatpush1.bf16.msra.mxu0 %v3259_v47  ;;  %2692 = vmatpush1.bf16.msra.mxu1 %v3263_v52 }
 0x686   :  { %2662 = vmatprep.subr.bf16.mxu0 %v3267_v56  ;;  %2694 = vmatprep.subr.bf16.mxu1 %v3271_v60 }
 0x689   :  { %2664 = vmatpush1.bf16.msra.mxu0 %v3278_v4  ;;  %2696 = vmatpush1.bf16.msra.mxu1 %v3282_v8  ;;  %v1750_v4 = vpop.permute.xlu0 %1749 }
 0x68a   :  { %2666 = vmatprep.subr.bf16.mxu0 %v3291_v14  ;;  %2698 = vmatprep.subr.bf16.mxu1 %v3295_v18  ;;  %vm1751_vm15 = vcmp.eq.s32.totalorder %v1750_v4, 1 }
 0x68d   :  { %2668 = vmatpush1.bf16.msra.mxu0 %v3302_v21  ;;  %2700 = vmatpush1.bf16.msra.mxu1 %v3307_v23  ;;  %v1938_v23 = vld [vmem:[#allocation8] sm:$0xff] }
 0x68e   :  { %v2702_v32 = vpack.c.bf16 %v1939_v33, %v1938_v23  ;;  %2701 = vmatprep.subr.bf16.mxu0 %v3064_v41 }
 0x743   :  { %v1642_v43 = vpop.f32.mrb[12].mxu0  ;;  %v1713_v48 = vpop.f32.mrb[12].mxu1 }
 0x744   :  { %v2737_v51 = vadd.f32 %v1642_v43, %v3362_v37  ;;  %v1644_v55 = vpop.f32.mrb[13].mxu0  ;;  %v1715_v58 = vpop.f32.mrb[13].mxu1  ;;  %v2753_v16 = vadd.f32 %v1713_v48, %v3371_v2 }
 0x745   :  { %v2738_v61 = vadd.f32 %v1644_v55, %v3364_v40  ;;  %v2754_v9 = vadd.f32 %v1715_v58, %v3368_v59 }
 0x746   :  { %v2114_v3 = vmul.f32 -1.442695, %v2737_v51 }
 0x747   :  { %v2115_v6 = vmul.f32 -1.442695, %v2738_v61  ;;  %v2116_v12 = vmul.f32 -1.442695, %v2754_v9 }
 0x748   :  { %2900 = vpow2.f32 %v2114_v3 }
 0x749   :  { %2902 = vpow2.f32 %v2115_v6 }
 0x74a   :  { %2904 = vpow2.f32 %v2116_v12 }
 0x74b   :  { %2906 = vtanh.f32 %v2753_v16 }
 0x752   :  { %v2901_v19 = vpop.eup %2900 }
 0x753   :  { %v2903_v1 = vpop.eup %2902  ;;  %v1725_v22 = vadd.f32 1.0, %v2901_v19 }
 0x754   :  { %v1731_v25 = vadd.f32 1.0, %v2903_v1  ;;  %v2905_v29 = vpop.eup %2904 }
 0x755   :  { %2908 = vrcp.f32 %v1725_v22  ;;  %v2907_v34 = vpop.eup %2906  ;;  %v1738_v52 = vadd.f32 1.0, %v2905_v29  ;;  %v1934_v22 = vpop.permute.xlu1 %1933 }
 0x756   :  { %2910 = vrcp.f32 %v1731_v25  ;;  %vm1935_vm1 = vcmp.eq.s32.totalorder %v1934_v22, 1 }
 0x757   :  { %2912 = vrcp.f32 %v1738_v52 }
 0x75f   :  { %v2909_v38 = vpop.eup %2908 }
 0x760   :  { %v2911_v42 = vpop.eup %2910  ;;  %v1742_v47 = vmul.f32 %v2909_v38, %v2907_v34  ;;  %v2120_v38 = vld [vmem:[%s3703_s6] ss:$0 sm:$0xff] }
 0x761   :  { %v1741_v56 = vmul.f32 %v2911_v42, %v3610_v26  ;;  %v2913_v8 = vpop.eup %2912  ;;  %v1953_v26 = vld [vmem:[#allocation8 + $0x78] sm:$0xff] }
 0x762   :  { %v2723_v27 = vpack.c.bf16 %v1953_v26, %v1952_v11 }
 0x763   :  { %v3657_v60 = vadd.f32 %v1742_v47, %v1741_v56 }
 0x765   :  { %2914 = vtanh.f32 %v3657_v60 }
 0x76f   :  { %v2915_v14 = vpop.eup %2914 }
 0x770   :  { %v1745_v18 = vmul.f32 %v2915_v14, %v2913_v8 }
 0x772   :  { %v3661_v21 = vsel %vm1751_vm15, %v1745_v18, %v3614_v35  ;;  %1825 = vmatmul.mubr.f32.vlgmr.msra.gmra.mrb[14].mxu0 %v1745_v18  ;;  %1896 = vmatmul.mubr.f32.vlgmr.msra.gmra.mrb[14].mxu1 %v1745_v18 }
 0x773   :  { %2703 = vmatpush3.bf16.msra.mxu0 %v2702_v32  ;;  %2170 = vmatprep.mubr.msk.f32.mxu0 %vm3065_vm0, %v3062_v0 }
 0x774   :  { %2704 = vmatprep.subr.bf16.mxu0 %v3064_v41 }
 0x777   :  { %2706 = vmatpush3.bf16.msra.mxu0 %v2705_v50 }
 0x778   :  { %2707 = vmatprep.subr.bf16.mxu0 %v3064_v41 }
 0x77b   :  { %2709 = vmatpush3.bf16.msra.mxu0 %v2708_v30 }
 0x77c   :  { %2710 = vmatprep.subr.bf16.mxu0 %v3064_v41 }
 0x77f   :  { %2712 = vmatpush3.bf16.msra.mxu0 %v2711_v57 }
 0x780   :  { %2713 = vmatprep.subr.bf16.mxu0 %v3064_v41 }
 0x783   :  { %2715 = vmatpush3.bf16.msra.mxu0 %v2714_v5 }
 0x784   :  { %2716 = vmatprep.subr.bf16.mxu0 %v3064_v41 }
 0x787   :  { %2718 = vmatpush3.bf16.msra.mxu0 %v2717_v63 }
 0x788   :  { %2719 = vmatprep.subr.bf16.mxu0 %v3064_v41 }
 0x78b   :  { %2721 = vmatpush3.bf16.msra.mxu0 %v2720_v20 }
 0x78c   :  { %2722 = vmatprep.subr.bf16.mxu0 %v3064_v41 }
 0x78f   :  { %2724 = vmatpush3.bf16.msra.mxu0 %v2723_v27 }
 0x845   :  { %v1826_v28 = vpop.f32.mrb[14].mxu0  ;;  %v1897_v46 = vpop.f32.mrb[14].mxu1 }
 0x846   :  { %v2739_v24 = vadd.f32 %v1826_v28, %v3362_v37  ;;  %v1828_v35 = vpop.f32.mrb[15].mxu0  ;;  %v1899_v36 = vpop.f32.mrb[15].mxu1  ;;  %v2755_v58 = vadd.f32 %v1897_v46, %v3371_v2 }
 0x847   :  { %v2740_v39 = vadd.f32 %v1828_v35, %v3364_v40  ;;  %v2756_v51 = vadd.f32 %v1899_v36, %v3368_v59 }
 0x848   :  { %v2117_v43 = vmul.f32 -1.442695, %v2739_v24 }
 0x849   :  { %v2118_v48 = vmul.f32 -1.442695, %v2740_v39  ;;  %v2119_v55 = vmul.f32 -1.442695, %v2756_v51 }
 0x84a   :  { %2916 = vpow2.f32 %v2117_v43 }
 0x84b   :  { %2918 = vpow2.f32 %v2118_v48 }
 0x84c   :  { %2920 = vpow2.f32 %v2119_v55 }
 0x84d   :  { %2922 = vtanh.f32 %v2755_v58 }
 0x854   :  { %v2917_v61 = vpop.eup %2916 }
 0x855   :  { %v2919_v3 = vpop.eup %2918  ;;  %v1909_v0 = vadd.f32 1.0, %v2917_v61 }
 0x856   :  { %v1915_v6 = vadd.f32 1.0, %v2919_v3  ;;  %v2921_v37 = vpop.eup %2920 }
 0x857   :  { %2924 = vrcp.f32 %v1909_v0  ;;  %v2923_v9 = vpop.eup %2922  ;;  %v1922_v19 = vadd.f32 1.0, %v2921_v37 }
 0x858   :  { %2926 = vrcp.f32 %v1915_v6 }
 0x859   :  { %2928 = vrcp.f32 %v1922_v19 }
 0x861   :  { %v2925_v40 = vpop.eup %2924 }
 0x862   :  { %v2927_v12 = vpop.eup %2926  ;;  %v1926_v16 = vmul.f32 %v2925_v40, %v2923_v9 }
 0x863   :  { %v1925_v1 = vmul.f32 %v2927_v12, %v3657_v60  ;;  %v2929_v2 = vpop.eup %2928 }
 0x865   :  { %v1927_v59 = vadd.f32 %v1926_v16, %v1925_v1 }
 0x867   :  { %2930 = vtanh.f32 %v1927_v59 }
 0x871   :  { %v2931_v25 = vpop.eup %2930 }
 0x872   :  { %v1929_v29 = vmul.f32 %v2931_v25, %v2929_v2 }
 0x874   :  { %v1936_v34 = vsel %vm1935_vm1, %v1929_v29, %v3661_v21 }
 0x875   :  { %1937 = vst [vmem:[#allocation9] sm:$0xff] %v1936_v34  ;;  %2171 = vmatmul.mubr.f32.vlgmr.msra.gmra.mrb[16].mxu0 %v1936_v34 }
 0x948   :  { %v2027_v42 = vpop.f32.mrb[16].mxu0 }
 0x949   :  { %v2028_v47 = vadd.f32 %v2120_v38, %v2027_v42  ;;  %v2172_v52 = vpop.f32.mrb[17].mxu0 }
 0x94b   :  { %2031 = vmax.xlane.f32.xlu0 %v2028_v47 }
 0x9d8   :  { %v2032_v56 = vpop.xlane.xlu0 %2031 }
 0x9d9   :  { %v2033_v60 = vsub.f32 %v2028_v47, %v2032_v56 }
 0x9db   :  { %v2034_v4 = vmul.f32 1.442695, %v2033_v60 }
 0x9dd   :  { %2932 = vpow2.f32 %v2034_v4 }
 0x9e7   :  { %v2933_v8 = vpop.eup %2932 }
 0x9e8   :  { %2036 = vadd.xlane.f32.xlu1 %v2933_v8 }
 0x9e9   :  { %3014 = shalt.err (!%p3011_p0)
}
 0x9ea   :  { %s3015_s5 = scalar_lea.hbm %s3704_s7, 128 }
 0x9eb   :  { %p3016_p1 = scmp.ne.s32.totalorder %s3704_s7, %s3015_s5  ;;  %p3019_p2 = scmp.lt.u32.totalorder %s3015_s5, %s3704_s7 }
 0x9ed   :  { %p3021_p3 = pnand %p3019_p2, %p3016_p1 }
 0x9ef   :  { %3024 = shalt.err (!%p3021_p3)
}
 0x9f0   :  { %2052 = dma.vmem_to_hbm [thread:$0]  %s2050_s30, 128, %s3704_s7, [#allocation5]  }
 0x9f1   :  { %s3067_s27 = smov [#allocation10]  }
 0x9f2   :  { %s2059_s29 = sshll.u32 %s3067_s27, 4  ;;  %s2060_s29 = int_to_ptr.vmem [resolvable:$true] %s2059_s29 }
 0x9f3   :  { %s3025_s3 = scalar_lea.vmem %s2060_s29, 128  ;;  %p3030_p5 = scmp.lt.s32.totalorder %s2060_s29, %s2060_s29 }
 0x9f4   :  { %p3026_p4 = scmp.ne.s32.totalorder %s2060_s29, %s3025_s3  ;;  %p3031_p6 = scmp.lt.s32.totalorder %s3025_s3, %s3025_s3 }
 0x9f6   :  { %p3032_p7 = por %p3031_p6, %p3030_p5 }
 0x9f8   :  { %p3033_p8 = pnand %p3032_p7, %p3026_p4 }
 0xa75   :  { %v2037_v14 = vpop.xlane.xlu1 %2036 }
 0xa76   :  { %2934 = vlog2.f32 %v2037_v14 }
 0xa80   :  { %v2935_v18 = vpop.eup %2934 }
 0xa81   :  { %v2039_v21 = vmul.f32 0.6931472, %v2935_v18 }
 0xa83   :  { %v2040_v23 = vadd.f32 %v2039_v21, %v2032_v56 }
 0xa85   :  { %v2041_v33 = vsub.f32 %v2028_v47, %v2040_v23 }
 0xa87   :  { %2042 = vst [vmem:[#allocation10] sm:$0xff] %v2041_v33 }
 0xa88   :  { %3036 = shalt.err (!%p3033_p8)
}
 0xa89   :  { %s3037_s7 = scalar_lea.hbm %s3705_s8, 128 }
 0xa8a   :  { %p3038_p9 = scmp.ne.s32.totalorder %s3705_s8, %s3037_s7  ;;  %p3041_p10 = scmp.lt.u32.totalorder %s3037_s7, %s3705_s8 }
 0xa8c   :  { %p3043_p11 = pnand %p3041_p10, %p3038_p9 }
 0xa8e   :  { %3046 = shalt.err (!%p3043_p11)
}
 0xa8f   :  { %2062 = dma.vmem_to_hbm [thread:$0]  %s2060_s29, 128, %s3705_s8, [#allocation11]  }
 0xa90   :  { %3051 = dma.done.wait [#allocation5], 128  }
 0xa91   :  { %3052 = vsyncadd [#allocation5], 4294967168 }
 0xa92   :  { %3053 = dma.done.wait [#allocation11], 128  }
 0xa93   :  { %3054 = vsyncadd [#allocation11], 4294967168 }
 0xa94   :  { %2069 = vsyncpa [#allocation4], 1 }
 0xa95   :  { %2070 = vsyncpa [#allocation7], 1 }
 0xa96   :  { %2071 = vsyncpa [#allocation5], 1 }
 0xa97   :  { %2072 = vsyncpa [#allocation11], 1 }

</bundles_post_ra>
